<compile_context>
chip_gen: v7x
topology: tpu7x:2x2x1
jax: 0.10.0
libtpu: 0.0.40
codegen_flags: <defaults>
</compile_context>

<pallas_src>
import functools

import numpy as np

import jax
import jax.numpy as jnp
from jax.experimental import pallas as pl
from jax.experimental.pallas import tpu as pltpu

_BN_EPS = 1e-5
_DILATIONS = ((1, 1), (3, 1), (1, 3), (3, 3))   # branch1x1, branch3x1, branch1x3, branch3x3
_OFF_VALS = (-3, -1, 0, 1, 3)
_OFFSETS = tuple((oh, ow) for oh in _OFF_VALS for ow in _OFF_VALS)
_OFF_INDEX = {o: i for i, o in enumerate(_OFFSETS)}
_PAD_TOP, _PAD_BOT, _PAD_LR = 4, 6, 4           # spatial zero padding (flat-index safety margin)

# Stage-2 taps at kw=2 on slack output columns read (flat-index) into the next
# row's left padding / first interior column of `mid`.  This is correct ONLY
# because (a) _PAD_LR >= 2 keeps those reads in-bounds of the flat plane,
# (b) the interior mask zeroes column 0 of every halo row, and (c) the final
# [:, :, :, :W] crop drops every slack output column.  Keep all three invariants.
assert _PAD_LR >= 2 and _PAD_BOT >= 3 and _PAD_TOP >= 3


def _spatial_gate_kernel(x_ref, wstack_ref, wc1s_ref, bnb_ref, wc2_ref, mask_ref,
                         o_ref, *, H, W, Cmid):
    RS = W + 2 * _PAD_LR        # row stride of the flattened, padded spatial plane
    NE1 = (H + 3) * RS          # rows of the 1-px-halo-extended intermediate (flat)
    NE2 = H * RS                # rows of the final map (flat)
    n_off = len(_OFFSETS)

    # ---- Stage 1: 4 dilated 3x3 branches fused into ONE fat MXU matmul --------
    # (25*Cmid, C) bf16  x  (C, NE_in) bf16  ->  (25*Cmid, NE_in) f32.
    # The 25 shifted adds operate on thin (Cmid, NE1) f32 slices of the result.
    r1 = jnp.dot(wstack_ref[...], x_ref[0], preferred_element_type=jnp.float32)

    acc1 = jnp.zeros((Cmid, NE1), jnp.float32)
    for o, (oh, ow) in enumerate(_OFFSETS):
        start = (oh + 3) * RS + (ow + 3)
        acc1 = acc1 + r1[o * Cmid:(o + 1) * Cmid, start:start + NE1]

    # Zero the 1-px halo / slack columns == zero padding of the following 3x3 conv.
    # Cast to bf16 so the stage-2 contraction feeds the MXU natively.
    mid = (acc1 * mask_ref[...]).astype(jnp.bfloat16)            # (Cmid, NE1)

    # ---- Stage 2: 3x3 conv (pad 1), BN scale pre-folded, on the MXU ------------
    # (9*Cmid, Cmid) bf16  x  (Cmid, NE1) bf16  ->  (9*Cmid, NE1) f32, then 9
    # shifted adds of thin slices (no per-input-channel VPU broadcast loop).
    r2 = jnp.dot(wc1s_ref[...], mid, preferred_element_type=jnp.float32)

    acc2 = jnp.zeros((Cmid, NE2), jnp.float32)
    for t in range(9):
        kh, kw = divmod(t, 3)
        s = kh * RS + kw
        acc2 = acc2 + r2[t * Cmid:(t + 1) * Cmid, s:s + NE2]

    acc2 = jnp.maximum(acc2 + bnb_ref[...], 0.0)                 # folded BN bias + ReLU

    # ---- Stage 3: 1x1 conv down to the single spatial attention map ------------
    sp = jnp.sum(acc2 * wc2_ref[...], axis=0, keepdims=True)     # (1, NE2) f32
    o_ref[0] = sp


def _interior_mask(H, W):
    """0/1 mask on the halo-extended flat grid: keeps the HxW interior only."""
    RS = W + 2 * _PAD_LR
    ie = np.arange(H + 3)[:, None]
    je = np.arange(RS)[None, :]
    m = ((ie >= 1) & (ie <= H) & (je >= 1) & (je <= W)).astype(np.float32)
    return m.reshape(1, (H + 3) * RS)


@jax.jit
def spatial_gate(x, params):
    """x: (B, C, H, W) -> (B, C, H, W): SpatialGate.forward (1-ch map expanded over C)."""
    B, C, H, W = x.shape
    Cmid = params['bnb'].shape[0]
    RS = W + 2 * _PAD_LR
    NE_in = (H + _PAD_TOP + _PAD_BOT) * RS
    NE1 = (H + 3) * RS
    NE2 = H * RS

    # One zero pad covers every dilated tap; NCHW needs no transpose for this layout.
    # TODO(synk): at production FPN sizes, build the top/bottom halo in-kernel from a
    # zero-initialized VMEM scratch (pad W only, or nothing) instead of materializing
    # a padded bf16 copy in HBM (~+50% activation HBM traffic, worst on v5e).
    xp = jnp.pad(x.astype(jnp.bfloat16),
                 ((0, 0), (0, 0), (_PAD_TOP, _PAD_BOT), (_PAD_LR, _PAD_LR)))
    xf = xp.reshape(B, C, NE_in)

    mask = jnp.asarray(_interior_mask(H, W))

    kernel = functools.partial(_spatial_gate_kernel, H=H, W=W, Cmid=Cmid)
    # TODO(synk): for production-size FPN levels (e.g. 256x160x160) add a row-tile
    # grid axis (3-row halo, ~32 data rows/tile, marked "parallel" for v7x's 2 TCs)
    # and set pltpu.CompilerParams(vmem_limit_bytes=...) so the per-step block and
    # the (25*Cmid, N_tile) stage-1 result fit scoped VMEM with double buffering;
    # whole-image blocks are fine at these small test sizes.
    # TODO(synk): for tiny levels (H,W<=16) pack several images per grid step on the
    # lane axis to amortize the ~0.35us/step overhead and fill the f32 sublanes.
    out_flat = pl.pallas_call(
        kernel,
        out_shape=jax.ShapeDtypeStruct((B, 1, NE2), jnp.float32),
        grid=(B,),
        in_specs=[
            pl.BlockSpec((1, C, NE_in), lambda b: (b, 0, 0)),
            pl.BlockSpec(params['wstack'].shape, lambda b: (0, 0)),
            pl.BlockSpec(params['wc1s'].shape, lambda b: (0, 0)),
            pl.BlockSpec(params['bnb'].shape, lambda b: (0, 0)),
            pl.BlockSpec(params['wc2'].shape, lambda b: (0, 0)),
            pl.BlockSpec((1, NE1), lambda b: (0, 0)),
        ],
        out_specs=pl.BlockSpec((1, 1, NE2), lambda b: (b, 0, 0)),
        compiler_params=pltpu.CompilerParams(dimension_semantics=("parallel",)),
    )(xf, params['wstack'], params['wc1s'], params['bnb'], params['wc2'], mask)

    # Un-flatten, drop slack columns, broadcast the 1-channel map over C.
    sp = out_flat.reshape(B, 1, H, RS)[:, :, :, :W]
    return jnp.broadcast_to(sp, (B, C, H, W))


def pack_params(branch_w, conv1_w, bn_gamma, bn_beta, bn_mean, bn_var, conv2_w):
    """Fold PyTorch-layout SpatialGate weights into the kernel's packed form.

    branch_w : list of 4 OIHW (Cb, C, 3, 3) weights in concat order
               [branch1x1, branch3x1, branch1x3, branch3x3]
    conv1_w  : OIHW (Cmid, Cmid, 3, 3) weight of conv[0]
    bn_*     : BatchNorm2d(Cmid) eval-mode params / running stats
    conv2_w  : OIHW (1, Cmid, 1, 1) weight of conv[3]
    Tap (kh, kw) has spatial offset ((kh-1)*dil_h, (kw-1)*dil_w), matching
    torch.nn.Conv2d (cross-correlation, no kernel flip).
    """
    branch_w = [np.asarray(w, np.float32) for w in branch_w]
    Cb, C = branch_w[0].shape[:2]
    Cmid = 4 * Cb

    # Combine the 4 dilated branches into one (Cmid, C) weight per unique offset,
    # then M-stack the 25 offsets into a single (25*Cmid, C) MXU operand.
    wcomb = np.zeros((len(_OFFSETS), Cmid, C), np.float32)
    for b, (dh, dw) in enumerate(_DILATIONS):
        for kh in range(3):
            for kw in range(3):
                o = _OFF_INDEX[((kh - 1) * dh, (kw - 1) * dw)]
                wcomb[o, b * Cb:(b + 1) * Cb, :] += branch_w[b][:, :, kh, kw]
    wstack = wcomb.reshape(len(_OFFSETS) * Cmid, C)

    # Fold eval-mode BatchNorm2d: scale into the 3x3 conv taps, bias kept separate.
    # M-stack the 9 taps into a single (9*Cmid, Cmid) MXU operand.
    scale = np.asarray(bn_gamma, np.float32) / np.sqrt(np.asarray(bn_var, np.float32) + _BN_EPS)
    bias = np.asarray(bn_beta, np.float32) - np.asarray(bn_mean, np.float32) * scale
    conv1_w = np.asarray(conv1_w, np.float32)
    wc1 = np.stack([scale[:, None] * conv1_w[:, :, kh, kw]
                    for kh in range(3) for kw in range(3)])          # (9, Cmid, Cmid)
    wc1s = wc1.reshape(9 * Cmid, Cmid)

    wc2 = np.asarray(conv2_w, np.float32)[0, :, 0, 0][:, None]       # (Cmid, 1)

    return {
        'wstack': jnp.asarray(wstack, jnp.bfloat16),  # stage-1 MXU operand (bf16)
        'wc1s': jnp.asarray(wc1s, jnp.bfloat16),      # stage-2 MXU operand (bf16)
        'bnb': jnp.asarray(bias[:, None], jnp.float32),
        'wc2': jnp.asarray(wc2, jnp.float32),
    }


def init_raw_params(key, gate_channel, reduction_ratio=16):
    C = gate_channel
    Cmid = C // reduction_ratio
    Cb = Cmid // 4
    assert Cb >= 1 and Cmid == 4 * Cb, "gate_channel must be divisible by 4*reduction_ratio"
    ks = jax.random.split(key, 10)

    def _n(k, shape, s):
        return jax.random.normal(k, shape, jnp.float32) * s

    return {
        'branch_w': [_n(ks[i], (Cb, C, 3, 3), 0.05) for i in range(4)],
        'conv1_w': _n(ks[4], (Cmid, Cmid, 3, 3), 0.1),
        'conv2_w': _n(ks[5], (1, Cmid, 1, 1), 0.2),
        'bn_gamma': 1.0 + 0.1 * jax.random.normal(ks[6], (Cmid,), jnp.float32),
        'bn_beta': 0.05 * jax.random.normal(ks[7], (Cmid,), jnp.float32),
        'bn_mean': 0.05 * jax.random.normal(ks[8], (Cmid,), jnp.float32),
        'bn_var': 1.0 + 0.1 * jnp.abs(jax.random.normal(ks[9], (Cmid,), jnp.float32)),
    }


def spatial_gate_reference(x, raw):
    """Pure-XLA f32 reference with PyTorch SpatialGate semantics (BN in eval mode)."""
    dn = ('NCHW', 'OIHW', 'NCHW')
    outs = []
    for w, (dh, dw) in zip(raw['branch_w'], _DILATIONS):
        outs.append(jax.lax.conv_general_dilated(
            x, w, window_strides=(1, 1), padding=((dh, dh), (dw, dw)),
            rhs_dilation=(dh, dw), dimension_numbers=dn))
    mid = jnp.concatenate(outs, axis=1)
    y = jax.lax.conv_general_dilated(mid, raw['conv1_w'], (1, 1), ((1, 1), (1, 1)),
                                     dimension_numbers=dn)
    g, b, m, v = raw['bn_gamma'], raw['bn_beta'], raw['bn_mean'], raw['bn_var']
    y = (y - m[None, :, None, None]) * jax.lax.rsqrt(v[None, :, None, None] + _BN_EPS) \
        * g[None, :, None, None] + b[None, :, None, None]
    y = jnp.maximum(y, 0.0)
    y = jax.lax.conv_general_dilated(y, raw['conv2_w'], (1, 1), ((0, 0), (0, 0)),
                                     dimension_numbers=dn)
    return jnp.broadcast_to(y, x.shape)


if __name__ == "__main__":
    key = jax.random.PRNGKey(0)
    C = 64                                   # gate_channel (must be divisible by 16*4)
    k_p, k_x0, k_x1 = jax.random.split(key, 3)
    raw = init_raw_params(k_p, C)
    params = pack_params(raw['branch_w'], raw['conv1_w'], raw['bn_gamma'],
                         raw['bn_beta'], raw['bn_mean'], raw['bn_var'], raw['conv2_w'])

    # Two small FPN levels, NCHW like PyTorch.
    x0 = jax.random.normal(k_x0, (2, C, 16, 16), jnp.float32)
    x1 = jax.random.normal(k_x1, (2, C, 8, 8), jnp.float32)

    y0 = spatial_gate(x0, params)
    y1 = spatial_gate(x1, params)
    jax.block_until_ready((y0, y1))

    assert y0.shape == (2, C, 16, 16) and y1.shape == (2, C, 8, 8)
    assert y0.dtype == jnp.float32 and y1.dtype == jnp.float32

    # Correctness vs a pure-XLA f32 reference (bf16 MXU operands -> loose tolerance).
    r0 = spatial_gate_reference(x0, raw)
    r1 = spatial_gate_reference(x1, raw)
    for y, r in ((y0, r0), (y1, r1)):
        err = float(jnp.max(jnp.abs(y - r)))
        assert err < 5e-2, f"max abs error vs reference: {err}"

    print("KERNEL_OK")
</pallas_src>

<mosaic_0001>
module attributes {stable_mosaic.version = 11 : i64} {
  func.func @_spatial_gate_kernel(%arg0: i32, %arg1: memref<1x64x624xbf16, #tpu.memory_space<vmem>>, %arg2: memref<100x64xbf16, #tpu.memory_space<vmem>>, %arg3: memref<36x4xbf16, #tpu.memory_space<vmem>>, %arg4: memref<4x1xf32, #tpu.memory_space<vmem>>, %arg5: memref<4x1xf32, #tpu.memory_space<vmem>>, %arg6: memref<1x456xf32, #tpu.memory_space<vmem>>, %arg7: memref<1x1x384xf32, #tpu.memory_space<vmem>>) attributes {dimension_semantics = [#tpu.dimension_semantics<parallel>], iteration_bounds = array<i64: 2>, scalar_prefetch = 0 : i64, scratch_operands = 0 : i64, tpu.core_type = #tpu.core_type<tc>, window_params = [{transform_indices = @transform_0, window_bounds = array<i64: 1, 64, 624>}, {pipeline_mode = #tpu.pipeline_mode<synchronous>, transform_indices = @transform_1, window_bounds = array<i64: 100, 64>}, {pipeline_mode = #tpu.pipeline_mode<synchronous>, transform_indices = @transform_2, window_bounds = array<i64: 36, 4>}, {pipeline_mode = #tpu.pipeline_mode<synchronous>, transform_indices = @transform_3, window_bounds = array<i64: 4, 1>}, {pipeline_mode = #tpu.pipeline_mode<synchronous>, transform_indices = @transform_4, window_bounds = array<i64: 4, 1>}, {pipeline_mode = #tpu.pipeline_mode<synchronous>, transform_indices = @transform_5, window_bounds = array<i64: 1, 456>}, {transform_indices = @transform_6, window_bounds = array<i64: 1, 1, 384>}]} {
    %c0 = arith.constant 0 : index
    %c0_0 = arith.constant 0 : index
    %0 = vector.load %arg2[%c0, %c0_0] : memref<100x64xbf16, #tpu.memory_space<vmem>>, vector<100x64xbf16>
    %c0_1 = arith.constant 0 : index
    %c0_2 = arith.constant 0 : index
    %c0_3 = arith.constant 0 : index
    %1 = vector.load %arg1[%c0_1, %c0_2, %c0_3] : memref<1x64x624xbf16, #tpu.memory_space<vmem>>, vector<1x64x624xbf16>
    %2 = vector.shape_cast %1 : vector<1x64x624xbf16> to vector<64x624xbf16>
    %cst = arith.constant dense<0.000000e+00> : vector<100x624xf32>
    %3 = tpu.matmul %0, %2, %cst {dimension_numbers = #tpu.dot_dimension_numbers<[1], [0], [0], [1], [0, 0, 1, 1], [], []>} : vector<100x64xbf16>, vector<64x624xbf16>, vector<100x624xf32> -> vector<100x624xf32>
    %cst_4 = arith.constant 0.000000e+00 : f32
    %4 = vector.broadcast %cst_4 : f32 to vector<4x456xf32>
    %5 = vector.extract_strided_slice %3 {offsets = [0, 0], sizes = [4, 456], strides = [1, 1]} : vector<100x624xf32> to vector<4x456xf32>
    %6 = arith.addf %4, %5 : vector<4x456xf32>
    %7 = vector.extract_strided_slice %3 {offsets = [4, 2], sizes = [4, 456], strides = [1, 1]} : vector<100x624xf32> to vector<4x456xf32>
    %8 = arith.addf %6, %7 : vector<4x456xf32>
    %9 = vector.extract_strided_slice %3 {offsets = [8, 3], sizes = [4, 456], strides = [1, 1]} : vector<100x624xf32> to vector<4x456xf32>
    %10 = arith.addf %8, %9 : vector<4x456xf32>
    %11 = vector.extract_strided_slice %3 {offsets = [12, 4], sizes = [4, 456], strides = [1, 1]} : vector<100x624xf32> to vector<4x456xf32>
    %12 = arith.addf %10, %11 : vector<4x456xf32>
    %13 = vector.extract_strided_slice %3 {offsets = [16, 6], sizes = [4, 456], strides = [1, 1]} : vector<100x624xf32> to vector<4x456xf32>
    %14 = arith.addf %12, %13 : vector<4x456xf32>
    %15 = vector.extract_strided_slice %3 {offsets = [20, 48], sizes = [4, 456], strides = [1, 1]} : vector<100x624xf32> to vector<4x456xf32>
    %16 = arith.addf %14, %15 : vector<4x456xf32>
    %17 = vector.extract_strided_slice %3 {offsets = [24, 50], sizes = [4, 456], strides = [1, 1]} : vector<100x624xf32> to vector<4x456xf32>
    %18 = arith.addf %16, %17 : vector<4x456xf32>
    %19 = vector.extract_strided_slice %3 {offsets = [28, 51], sizes = [4, 456], strides = [1, 1]} : vector<100x624xf32> to vector<4x456xf32>
    %20 = arith.addf %18, %19 : vector<4x456xf32>
    %21 = vector.extract_strided_slice %3 {offsets = [32, 52], sizes = [4, 456], strides = [1, 1]} : vector<100x624xf32> to vector<4x456xf32>
    %22 = arith.addf %20, %21 : vector<4x456xf32>
    %23 = vector.extract_strided_slice %3 {offsets = [36, 54], sizes = [4, 456], strides = [1, 1]} : vector<100x624xf32> to vector<4x456xf32>
    %24 = arith.addf %22, %23 : vector<4x456xf32>
    %25 = vector.extract_strided_slice %3 {offsets = [40, 72], sizes = [4, 456], strides = [1, 1]} : vector<100x624xf32> to vector<4x456xf32>
    %26 = arith.addf %24, %25 : vector<4x456xf32>
    %27 = vector.extract_strided_slice %3 {offsets = [44, 74], sizes = [4, 456], strides = [1, 1]} : vector<100x624xf32> to vector<4x456xf32>
    %28 = arith.addf %26, %27 : vector<4x456xf32>
    %29 = vector.extract_strided_slice %3 {offsets = [48, 75], sizes = [4, 456], strides = [1, 1]} : vector<100x624xf32> to vector<4x456xf32>
    %30 = arith.addf %28, %29 : vector<4x456xf32>
    %31 = vector.extract_strided_slice %3 {offsets = [52, 76], sizes = [4, 456], strides = [1, 1]} : vector<100x624xf32> to vector<4x456xf32>
    %32 = arith.addf %30, %31 : vector<4x456xf32>
    %33 = vector.extract_strided_slice %3 {offsets = [56, 78], sizes = [4, 456], strides = [1, 1]} : vector<100x624xf32> to vector<4x456xf32>
    %34 = arith.addf %32, %33 : vector<4x456xf32>
    %35 = vector.extract_strided_slice %3 {offsets = [60, 96], sizes = [4, 456], strides = [1, 1]} : vector<100x624xf32> to vector<4x456xf32>
    %36 = arith.addf %34, %35 : vector<4x456xf32>
    %37 = vector.extract_strided_slice %3 {offsets = [64, 98], sizes = [4, 456], strides = [1, 1]} : vector<100x624xf32> to vector<4x456xf32>
    %38 = arith.addf %36, %37 : vector<4x456xf32>
    %39 = vector.extract_strided_slice %3 {offsets = [68, 99], sizes = [4, 456], strides = [1, 1]} : vector<100x624xf32> to vector<4x456xf32>
    %40 = arith.addf %38, %39 : vector<4x456xf32>
    %41 = vector.extract_strided_slice %3 {offsets = [72, 100], sizes = [4, 456], strides = [1, 1]} : vector<100x624xf32> to vector<4x456xf32>
    %42 = arith.addf %40, %41 : vector<4x456xf32>
    %43 = vector.extract_strided_slice %3 {offsets = [76, 102], sizes = [4, 456], strides = [1, 1]} : vector<100x624xf32> to vector<4x456xf32>
    %44 = arith.addf %42, %43 : vector<4x456xf32>
    %45 = vector.extract_strided_slice %3 {offsets = [80, 144], sizes = [4, 456], strides = [1, 1]} : vector<100x624xf32> to vector<4x456xf32>
    %46 = arith.addf %44, %45 : vector<4x456xf32>
    %47 = vector.extract_strided_slice %3 {offsets = [84, 146], sizes = [4, 456], strides = [1, 1]} : vector<100x624xf32> to vector<4x456xf32>
    %48 = arith.addf %46, %47 : vector<4x456xf32>
    %49 = vector.extract_strided_slice %3 {offsets = [88, 147], sizes = [4, 456], strides = [1, 1]} : vector<100x624xf32> to vector<4x456xf32>
    %50 = arith.addf %48, %49 : vector<4x456xf32>
    %51 = vector.extract_strided_slice %3 {offsets = [92, 148], sizes = [4, 456], strides = [1, 1]} : vector<100x624xf32> to vector<4x456xf32>
    %52 = arith.addf %50, %51 : vector<4x456xf32>
    %53 = vector.extract_strided_slice %3 {offsets = [96, 150], sizes = [4, 456], strides = [1, 1]} : vector<100x624xf32> to vector<4x456xf32>
    %54 = arith.addf %52, %53 : vector<4x456xf32>
    %c0_5 = arith.constant 0 : index
    %c0_6 = arith.constant 0 : index
    %55 = vector.load %arg6[%c0_5, %c0_6] : memref<1x456xf32, #tpu.memory_space<vmem>>, vector<1x456xf32>
    %56 = vector.broadcast %55 : vector<1x456xf32> to vector<4x456xf32>
    %57 = arith.mulf %54, %56 : vector<4x456xf32>
    %58 = arith.truncf %57 : vector<4x456xf32> to vector<4x456xbf16>
    %c0_7 = arith.constant 0 : index
    %c0_8 = arith.constant 0 : index
    %59 = vector.load %arg3[%c0_7, %c0_8] : memref<36x4xbf16, #tpu.memory_space<vmem>>, vector<36x4xbf16>
    %cst_9 = arith.constant dense<0.000000e+00> : vector<36x456xf32>
    %60 = tpu.matmul %59, %58, %cst_9 {dimension_numbers = #tpu.dot_dimension_numbers<[1], [0], [0], [1], [0, 0, 1, 1], [], []>} : vector<36x4xbf16>, vector<4x456xbf16>, vector<36x456xf32> -> vector<36x456xf32>
    %cst_10 = arith.constant 0.000000e+00 : f32
    %61 = vector.broadcast %cst_10 : f32 to vector<4x384xf32>
    %62 = vector.extract_strided_slice %60 {offsets = [0, 0], sizes = [4, 384], strides = [1, 1]} : vector<36x456xf32> to vector<4x384xf32>
    %63 = arith.addf %61, %62 : vector<4x384xf32>
    %64 = vector.extract_strided_slice %60 {offsets = [4, 1], sizes = [4, 384], strides = [1, 1]} : vector<36x456xf32> to vector<4x384xf32>
    %65 = arith.addf %63, %64 : vector<4x384xf32>
    %66 = vector.extract_strided_slice %60 {offsets = [8, 2], sizes = [4, 384], strides = [1, 1]} : vector<36x456xf32> to vector<4x384xf32>
    %67 = arith.addf %65, %66 : vector<4x384xf32>
    %68 = vector.extract_strided_slice %60 {offsets = [12, 24], sizes = [4, 384], strides = [1, 1]} : vector<36x456xf32> to vector<4x384xf32>
    %69 = arith.addf %67, %68 : vector<4x384xf32>
    %70 = vector.extract_strided_slice %60 {offsets = [16, 25], sizes = [4, 384], strides = [1, 1]} : vector<36x456xf32> to vector<4x384xf32>
    %71 = arith.addf %69, %70 : vector<4x384xf32>
    %72 = vector.extract_strided_slice %60 {offsets = [20, 26], sizes = [4, 384], strides = [1, 1]} : vector<36x456xf32> to vector<4x384xf32>
    %73 = arith.addf %71, %72 : vector<4x384xf32>
    %74 = vector.extract_strided_slice %60 {offsets = [24, 48], sizes = [4, 384], strides = [1, 1]} : vector<36x456xf32> to vector<4x384xf32>
    %75 = arith.addf %73, %74 : vector<4x384xf32>
    %76 = vector.extract_strided_slice %60 {offsets = [28, 49], sizes = [4, 384], strides = [1, 1]} : vector<36x456xf32> to vector<4x384xf32>
    %77 = arith.addf %75, %76 : vector<4x384xf32>
    %78 = vector.extract_strided_slice %60 {offsets = [32, 50], sizes = [4, 384], strides = [1, 1]} : vector<36x456xf32> to vector<4x384xf32>
    %79 = arith.addf %77, %78 : vector<4x384xf32>
    %c0_11 = arith.constant 0 : index
    %c0_12 = arith.constant 0 : index
    %80 = vector.load %arg4[%c0_11, %c0_12] : memref<4x1xf32, #tpu.memory_space<vmem>>, vector<4x1xf32>
    %81 = vector.broadcast %80 : vector<4x1xf32> to vector<4x384xf32>
    %82 = arith.addf %79, %81 : vector<4x384xf32>
    %cst_13 = arith.constant 0.000000e+00 : f32
    %83 = vector.broadcast %cst_13 : f32 to vector<4x384xf32>
    %84 = arith.maximumf %82, %83 : vector<4x384xf32>
    %c0_14 = arith.constant 0 : index
    %c0_15 = arith.constant 0 : index
    %85 = vector.load %arg5[%c0_14, %c0_15] : memref<4x1xf32, #tpu.memory_space<vmem>>, vector<4x1xf32>
    %86 = vector.broadcast %85 : vector<4x1xf32> to vector<4x384xf32>
    %87 = arith.mulf %84, %86 : vector<4x384xf32>
    %cst_16 = arith.constant dense<0.000000e+00> : vector<384xf32>
    %88 = vector.multi_reduction <add>, %87, %cst_16 [0] : vector<4x384xf32> to vector<384xf32>
    %89 = vector.shape_cast %88 : vector<384xf32> to vector<1x384xf32>
    %c0_17 = arith.constant 0 : index
    %c0_18 = arith.constant 0 : index
    %c0_19 = arith.constant 0 : index
    %90 = vector.load %arg7[%c0_17, %c0_18, %c0_19] : memref<1x1x384xf32, #tpu.memory_space<vmem>>, vector<1x1x384xf32>
    %91 = vector.shape_cast %90 : vector<1x1x384xf32> to vector<1x384xf32>
    %92 = vector.shape_cast %89 : vector<1x384xf32> to vector<1x1x384xf32>
    tpu.vector_store %arg7[%c0_17, %c0_18, %c0_19], %92 {strides = array<i32>} : memref<1x1x384xf32, #tpu.memory_space<vmem>>, vector<1x1x384xf32>,
    return
  }
  func.func @transform_0(%arg0: i32) -> (i32, i32, i32) {
    %c0_i32 = arith.constant 0 : i32
    %c0_i32_0 = arith.constant 0 : i32
    %c0_i32_1 = arith.constant 0 : i32
    return %arg0, %c0_i32, %c0_i32_0 : i32, i32, i32
  }
  func.func @transform_1(%arg0: i32) -> (i32, i32) {
    %c0_i32 = arith.constant 0 : i32
    %c0_i32_0 = arith.constant 0 : i32
    %c0_i32_1 = arith.constant 0 : i32
    return %c0_i32, %c0_i32_0 : i32, i32
  }
  func.func @transform_2(%arg0: i32) -> (i32, i32) {
    %c0_i32 = arith.constant 0 : i32
    %c0_i32_0 = arith.constant 0 : i32
    %c0_i32_1 = arith.constant 0 : i32
    return %c0_i32, %c0_i32_0 : i32, i32
  }
  func.func @transform_3(%arg0: i32) -> (i32, i32) {
    %c0_i32 = arith.constant 0 : i32
    %c0_i32_0 = arith.constant 0 : i32
    %c0_i32_1 = arith.constant 0 : i32
    return %c0_i32, %c0_i32_0 : i32, i32
  }
  func.func @transform_4(%arg0: i32) -> (i32, i32) {
    %c0_i32 = arith.constant 0 : i32
    %c0_i32_0 = arith.constant 0 : i32
    %c0_i32_1 = arith.constant 0 : i32
    return %c0_i32, %c0_i32_0 : i32, i32
  }
  func.func @transform_5(%arg0: i32) -> (i32, i32) {
    %c0_i32 = arith.constant 0 : i32
    %c0_i32_0 = arith.constant 0 : i32
    %c0_i32_1 = arith.constant 0 : i32
    return %c0_i32, %c0_i32_0 : i32, i32
  }
  func.func @transform_6(%arg0: i32) -> (i32, i32, i32) {
    %c0_i32 = arith.constant 0 : i32
    %c0_i32_0 = arith.constant 0 : i32
    %c0_i32_1 = arith.constant 0 : i32
    return %arg0, %c0_i32, %c0_i32_0 : i32, i32, i32
  }
}

</mosaic_0001>

<bundles_post_ra>
// kernel: spatial_gate.1
= control target key start
LH: loop header
LB: loop body
LE: loop exit
PB: predicated region body
PF: predicated region fallthrough
CT: control target
= control target key end

     0   :  { %s2127_s21 = smov 0   ;;  %s2962_s0 = inlined_call_operand.vmem [shape: bf16[2,64,624], index: 0, kind: input, shape index: {}]   ;;  %s2963_s1 = inlined_call_operand.vmem [shape: bf16[100,64], index: 1, kind: input, shape index: {}]   ;;  %s2964_s2 = inlined_call_operand.vmem [shape: bf16[36,4], index: 2, kind: input, shape index: {}]   ;;  %s2965_s3 = inlined_call_operand.vmem [shape: f32[4,1], index: 3, kind: input, shape index: {}]   ;;  %s2966_s4 = inlined_call_operand.vmem [shape: f32[4,1], index: 4, kind: input, shape index: {}]   ;;  %s2967_s5 = inlined_call_operand.vmem [shape: f32[1,456], index: 5, kind: input, shape index: {}]   ;;  %s2968_s6 = inlined_call_operand.vmem [shape: f32[2,1,384], index: 6, kind: output, shape index: {}]  }
   0x1 LB: > { %s1854_s22 = sadd.s32 4294967295, %s2057_s21   ;;  %p1858_p0 = scmp.ge.s32.totalorder %s2057_s21, 1  ;;  %s2057_s21 = sphi %s2127_s21, %s16_s21  }
   0x2   : > { %p212_p1 = scmp.lt.s32.totalorder %s2057_s21, 3 }
   0x4   : > { %p213_p2 = pnand %p1858_p0, %p212_p1 }
   0x5   : > { %p241_p3 = scmp.lt.s32.totalorder (!%p213_p2), %s1854_s22, 1  ;;  %v2059_v0 = vmov (!%p213_p2), 0   ;;  %v2037_v17 = vld [vmem:[%s2963_s1] sm:$0xff] (!%p213_p2)   ;;  %vm425_vm0 = vcmask (!%p213_p2), 523264   ;;  %v2060_v18 = vmov (!%p213_p2), 0.0   ;;  %v2038_v21 = vld [vmem:[%s2963_s1 + $0x8] sm:$0xff] (!%p213_p2)  }
   0x6   : > { %216 = sbr.rel (%p213_p2) target bundleno = 982 (0x3d6), region = 44  ;;  %479 = vmatprep.mubr.bf16.mxu0 (!%p213_p2), %v2059_v0  ;;  %577 = vmatprep.mubr.bf16.mxu1 (!%p213_p2), %v2059_v0  ;;  %v2039_v24 = vld [vmem:[%s2963_s1 + $0x10] sm:$0xff] (!%p213_p2)   ;;  %v2040_v25 = vld [vmem:[%s2963_s1 + $0x18] sm:$0xff] (!%p213_p2)   ;;  %v2041_v26 = vld [vmem:[%s2963_s1 + $0x20] sm:$0xff] (!%p213_p2)   ;;  %vm2061_vm1 = vmmov (!%p213_p2), 0   ;;  %s2062_s17 = smov (!%p213_p2), 126  }
   0x7   : > { %2011 = vset.pattern.permute.xlu1 (!%p213_p2), %v2059_v0  ;;  %2012 = vset.pattern.permute.xlu0 (!%p213_p2), %v2059_v0  ;;  %v2042_v27 = vld [vmem:[%s2963_s1 + $0x28] sm:$0xff] (!%p213_p2)   ;;  %v2045_v28 = vld [vmem:[%s2963_s1 + $0x30] ss:$0 sps:$4 sm:$0x33] (!%p213_p2)   ;;  %s2063_s18 = smov (!%p213_p2), 125   ;;  %s2064_s19 = smov (!%p213_p2), 124  }
   0x8   : > { %s2065_s20 = smov (!%p213_p2), 122   ;;  %s2067_s24 = smov (!%p213_p2), 80   ;;  %vm2971_vm2 = vcmask (!%p213_p2), 1031168   ;;  %vm773_vm3 = vcmask (!%p213_p2), 1022976   ;;  %vm797_vm4 = vcmask (!%p213_p2), 1014784   ;;  %vm821_vm5 = vcmask (!%p213_p2), 998400  }
   0x9   : > { %s2068_s25 = smov (!%p213_p2), 77   ;;  %s2070_s27 = smov (!%p213_p2), 56   ;;  %vm2970_vm6 = vcmask (!%p213_p2), 654336   ;;  %vm2969_vm7 = vcmask (!%p213_p2), 637952   ;;  %vm893_vm8 = vcmask (!%p213_p2), 629760   ;;  %vm917_vm9 = vcmask (!%p213_p2), 621568  }
   0xa   : > { %s2071_s28 = smov (!%p213_p2), 74   ;;  %s2072_s29 = smov (!%p213_p2), 54   ;;  %vm941_vm10 = vcmask (!%p213_p2), 605184   ;;  %vm968_vm11 = vcmask (!%p213_p2), 457728   ;;  %vm996_vm12 = vcmask (!%p213_p2), 441344   ;;  %vm1052_vm13 = vcmask (!%p213_p2), 424960  }
   0xb   : > { %s2073_s30 = smov (!%p213_p2), 53   ;;  %s2074_s7 = smov (!%p213_p2), 52   ;;  %vm1024_vm14 = vcmask (!%p213_p2), 433152   ;;  %vm1080_vm15 = vcmask (!%p213_p2), 408576  }
   0xc   : > { %s2075_s8 = smov (!%p213_p2), 50   ;;  %s2076_s9 = smov (!%p213_p2), 32  }
   0xd   : > { %s2982_s22 = smov (!%p241_p3, %s1854_s22), 1  ;;  %s2077_s10 = smov 30  }
   0xe   : > { %s1968_s23 = smul.u32 160, %s2982_s22  ;;  %s2078_s11 = smov 29  }
   0xf   : > { %s2079_s12 = smov 28   ;;  %s2080_s13 = smov 26  }
  0x10   : > { %s2145_s26 = scalar_lea.vmem %s2962_s0, %s1968_s23  ;;  %s2066_s23 = smov 78  }
  0x11   : > { %v2013_v1 = vld [vmem:[%s2145_s26 + $0x4] ss:$20 sps:$4 sm:$0xff]   ;;  %v2015_v2 = vld [vmem:[%s2145_s26 + $0xc] ss:$20 sps:$4 sm:$0xff]   ;;  %v2018_v4 = vld [vmem:[%s2145_s26 + $0x8] ss:$20 sps:$4 sm:$0xff]  }
  0x12   : > { %447 = vmatprep.subr.bf16.mxu0 %v2013_v1  ;;  %v2017_v3 = vld [vmem:[%s2145_s26] ss:$20 sps:$4 sm:$0xff]   ;;  %545 = vmatprep.subr.bf16.mxu1 %v2015_v2  ;;  %v2023_v7 = vld [vmem:[%s2145_s26 + $0x28] ss:$20 sps:$4 sm:$0xff]   ;;  %v2024_v8 = vld [vmem:[%s2145_s26 + $0x30] ss:$20 sps:$4 sm:$0xff]  }
  0x13   : > { %v2019_v5 = vld [vmem:[%s2145_s26 + $0x2c] ss:$20 sps:$4 sm:$0xff]   ;;  %448 = vmatpush1.bf16.msra.mxu0 %v2017_v3  ;;  %546 = vmatpush1.bf16.msra.mxu1 %v2018_v4  ;;  %v2021_v6 = vld [vmem:[%s2145_s26 + $0x34] ss:$20 sps:$4 sm:$0xff]   ;;  %v2027_v10 = vld [vmem:[%s2145_s26 + $0x5c] ss:$20 sps:$4 sm:$0xff]  }
  0x14   : > { %449 = vmatprep.subr.bf16.mxu0 %v2019_v5  ;;  %547 = vmatprep.subr.bf16.mxu1 %v2021_v6  ;;  %v2025_v9 = vld [vmem:[%s2145_s26 + $0x54] ss:$20 sps:$4 sm:$0xff]   ;;  %v2029_v11 = vld [vmem:[%s2145_s26 + $0x50] ss:$20 sps:$4 sm:$0xff]   ;;  %v2030_v12 = vld [vmem:[%s2145_s26 + $0x58] ss:$20 sps:$4 sm:$0xff]  }
  0x15   : > { %v2031_v13 = vld [vmem:[%s2145_s26 + $0x7c] ss:$20 sps:$4 sm:$0xff]   ;;  %v2033_v14 = vld [vmem:[%s2145_s26 + $0x84] ss:$20 sps:$4 sm:$0xff]   ;;  %v2036_v16 = vld [vmem:[%s2145_s26 + $0x80] ss:$20 sps:$4 sm:$0xff]  }
  0x16   : > { %v2035_v15 = vld [vmem:[%s2145_s26 + $0x78] ss:$20 sps:$4 sm:$0xff]   ;;  %v2043_v19 = vld [vmem:[%s2145_s26 + $0x10] ss:$20 sps:$4 sm:$0xff]   ;;  %v2046_v22 = vld [vmem:[%s2145_s26 + $0x60] ss:$20 sps:$4 sm:$0xff]  }
  0x17   : > { %450 = vmatpush1.bf16.msra.mxu0 %v2023_v7  ;;  %548 = vmatpush1.bf16.msra.mxu1 %v2024_v8  ;;  %v2044_v20 = vld [vmem:[%s2145_s26 + $0x38] ss:$20 sps:$4 sm:$0xff]   ;;  %v2047_v23 = vld [vmem:[%s2145_s26 + $0x88] ss:$20 sps:$4 sm:$0xff]   ;;  %s2069_s26 = smov 76   ;;  %s2081_s14 = smov 112  }
  0x18   : > { %451 = vmatprep.subr.bf16.mxu0 %v2025_v9  ;;  %549 = vmatprep.subr.bf16.mxu1 %v2027_v10  ;;  %s2082_s15 = smov 110   ;;  %s2083_s16 = smov 109  }
  0x1b   : > { %452 = vmatpush1.bf16.msra.mxu0 %v2029_v11  ;;  %550 = vmatpush1.bf16.msra.mxu1 %v2030_v12 }
  0x1c   : > { %453 = vmatprep.subr.bf16.mxu0 %v2031_v13  ;;  %551 = vmatprep.subr.bf16.mxu1 %v2033_v14 }
  0x1f   : > { %454 = vmatpush1.bf16.msra.mxu0 %v2035_v15  ;;  %552 = vmatpush1.bf16.msra.mxu1 %v2036_v16 }
  0x20   : > { %1932 = vmatprep.subr.bf16.mxu0 %v2060_v18 }
  0x22   : > { %1887 = vmatmul.mubr.msk.bf16.vlgmr.msra.gmra.mrb[0].mxu0 %vm425_vm0, %v2037_v17  ;;  %1894 = vmatmul.mubr.msk.bf16.vlgmr.msra.gmra.mrb[0].mxu1 %vm425_vm0, %v2037_v17 }
  0x23   : > { %489 = vmatprep.mubr.bf16.mxu0 %v2059_v0  ;;  %587 = vmatprep.mubr.bf16.mxu1 %v2059_v0 }
  0x24   : > { %1933 = vmatpush3.bf16.msra.mxu0 %v2043_v19 }
  0x25   : > { %1934 = vmatprep.subr.bf16.mxu0 %v2060_v18 }
  0x28   : > { %1935 = vmatpush3.bf16.msra.mxu0 %v2044_v20 }
  0x29   : > { %1936 = vmatprep.subr.bf16.mxu0 %v2060_v18 }
  0x2a   : > { %1888 = vmatmul.mubr.msk.bf16.gmra.mrb[4].mxu0 %vm425_vm0, %v2038_v21  ;;  %1895 = vmatmul.mubr.msk.bf16.gmra.mrb[4].mxu1 %vm425_vm0, %v2038_v21 }
  0x2b   : > { %499 = vmatprep.mubr.bf16.mxu0 %v2059_v0  ;;  %597 = vmatprep.mubr.bf16.mxu1 %v2059_v0 }
  0x2c   : > { %1937 = vmatpush3.bf16.msra.mxu0 %v2046_v22 }
  0x2d   : > { %1938 = vmatprep.subr.bf16.mxu0 %v2060_v18 }
  0x30   : > { %1939 = vmatpush3.bf16.msra.mxu0 %v2047_v23 }
  0x32   : > { %1889 = vmatmul.mubr.msk.bf16.gmra.mrb[8].mxu0 %vm425_vm0, %v2039_v24  ;;  %1896 = vmatmul.mubr.msk.bf16.gmra.mrb[8].mxu1 %vm425_vm0, %v2039_v24 }
  0x33   : > { %509 = vmatprep.mubr.bf16.mxu0 %v2059_v0  ;;  %607 = vmatprep.mubr.bf16.mxu1 %v2059_v0 }
  0x3a   : > { %1890 = vmatmul.mubr.msk.bf16.gmra.mrb[12].mxu0 %vm425_vm0, %v2040_v25  ;;  %1897 = vmatmul.mubr.msk.bf16.gmra.mrb[12].mxu1 %vm425_vm0, %v2040_v25 }
  0x3b   : > { %519 = vmatprep.mubr.bf16.mxu0 %v2059_v0  ;;  %617 = vmatprep.mubr.bf16.mxu1 %v2059_v0 }
  0x42   : > { %1891 = vmatmul.mubr.msk.bf16.gmra.mrb[16].mxu0 %vm425_vm0, %v2041_v26  ;;  %1898 = vmatmul.mubr.msk.bf16.gmra.mrb[16].mxu1 %vm425_vm0, %v2041_v26 }
  0x43   : > { %529 = vmatprep.mubr.bf16.mxu0 %v2059_v0  ;;  %627 = vmatprep.mubr.bf16.mxu1 %v2059_v0 }
  0x4a   : > { %1892 = vmatmul.mubr.msk.bf16.gmra.mrb[20].mxu0 %vm425_vm0, %v2042_v27  ;;  %1899 = vmatmul.mubr.msk.bf16.gmra.mrb[20].mxu1 %vm425_vm0, %v2042_v27 }
  0x4b   : > { %537 = vmatprep.mubr.bf16.mxu0 %v2059_v0  ;;  %637 = vmatprep.mubr.bf16.mxu1 %v2059_v0 }
  0x52   : > { %1893 = vmatmul.mubr.msk.bf16.gmra.mrb[24].mxu0 %vm425_vm0, %v2045_v28  ;;  %1900 = vmatmul.mubr.msk.bf16.gmra.mrb[24].mxu1 %vm425_vm0, %v2045_v28 }
  0x53   : > { %1940 = vmatprep.mubr.msk.bf16.mxu0 %vm2061_vm1, %v2060_v18  ;;  %1456 = vmatprep.mubr.bf16.mxu1 %v2059_v0 }
  0x5a   : > { %1941 = vmatmul.mubr.msk.bf16.vlgmr.msra.gmra.mrb[28].mxu0 %vm425_vm0, %v2037_v17 }
  0x5b   : > { %1944 = vmatprep.mubr.msk.bf16.mxu0 %vm2061_vm1, %v2060_v18 }
  0x62   : > { %1945 = vmatmul.mubr.msk.bf16.gmra.mrb[32].mxu0 %vm425_vm0, %v2038_v21 }
  0x63   : > { %1948 = vmatprep.mubr.msk.bf16.mxu0 %vm2061_vm1, %v2060_v18 }
  0x6a   : > { %1949 = vmatmul.mubr.msk.bf16.gmra.mrb[36].mxu0 %vm425_vm0, %v2039_v24 }
  0x6b   : > { %1952 = vmatprep.mubr.msk.bf16.mxu0 %vm2061_vm1, %v2060_v18 }
  0x72   : > { %1953 = vmatmul.mubr.msk.bf16.gmra.mrb[40].mxu0 %vm425_vm0, %v2040_v25 }
  0x73   : > { %1956 = vmatprep.mubr.msk.bf16.mxu0 %vm2061_vm1, %v2060_v18 }
  0x7a   : > { %1957 = vmatmul.mubr.msk.bf16.gmra.mrb[44].mxu0 %vm425_vm0, %v2041_v26 }
  0x7b   : > { %1960 = vmatprep.mubr.msk.bf16.mxu0 %vm2061_vm1, %v2060_v18 }
  0x82   : > { %1961 = vmatmul.mubr.msk.bf16.gmra.mrb[48].mxu0 %vm425_vm0, %v2042_v27 }
  0x83   : > { %1964 = vmatprep.mubr.msk.bf16.mxu0 %vm2061_vm1, %v2060_v18  ;;  %vm1136_vm1 = vcmask 244736  }
  0x8a   : > { %1965 = vmatmul.mubr.msk.bf16.gmra.mrb[52].mxu0 %vm425_vm0, %v2045_v28  ;;  %vm1108_vm0 = vcmask 261120  }
  0xf5   : > { %v2222_v29 = vpop.f32.mrb[0].mxu0  ;;  %v2224_v30 = vpop.f32.mrb[0].mxu1 }
  0xf6   : > { %v2226_v31 = vpop.f32.mrb[1].mxu1  ;;  %v2228_v32 = vpop.f32.mrb[1].mxu0  ;;  %v739_v33 = vrot.slane %v2224_v30, 4  ;;  %v737_v34 = vrot.slane %v2222_v29, 4 }
  0xf7   : > { %v583_v35 = vpop.f32.mrb[2].mxu1  ;;  %v485_v36 = vpop.f32.mrb[2].mxu0  ;;  %v738_v39 = vrot.slane %v2228_v32, 4  ;;  %v740_v48 = vrot.slane %v2226_v31, 4 }
  0xf8   : > { %745 = vrot.lane.b32.xlu1 %v739_v33, %s2062_s17  ;;  %v585_v37 = vpop.f32.mrb[3].mxu1  ;;  %741 = vrot.lane.b32.xlu0 %v737_v34, %s2062_s17  ;;  %v487_v38 = vpop.f32.mrb[3].mxu0  ;;  %v785_v58 = vrot.slane %v485_v36, 4  ;;  %v787_v61 = vrot.slane %v583_v35, 4 }
  0xf9   : > { %v786_v49 = vrot.slane %v487_v38, 4  ;;  %v788_v5 = vrot.slane %v585_v37, 4 }
  0xfc   : > { %743 = vrot.lane.b32.xlu0 %v738_v39, %s2062_s17  ;;  %765 = vrot.lane.b32.xlu1 %v485_v36, %s2063_s18 }
  0xfd   : > { %v2236_v40 = vpop.f32.mrb[4].mxu0  ;;  %v2238_v41 = vpop.f32.mrb[4].mxu1 }
  0xfe   : > { %v493_v42 = vpop.f32.mrb[5].mxu0  ;;  %v2240_v43 = vpop.f32.mrb[5].mxu1  ;;  %v833_v18 = vrot.slane %v2236_v40, 4  ;;  %v835_v25 = vrot.slane %v2238_v41, 4 }
  0xff   : > { %v2242_v44 = vpop.f32.mrb[6].mxu0  ;;  %v2244_v45 = vpop.f32.mrb[6].mxu1  ;;  %v834_v8 = vrot.slane %v493_v42, 4 }
 0x100   : > { %769 = vrot.lane.b32.xlu1 %v583_v35, %s2063_s18  ;;  %767 = vrot.lane.b32.xlu0 %v487_v38, %s2063_s18  ;;  %v2246_v46 = vpop.f32.mrb[7].mxu0  ;;  %v2248_v47 = vpop.f32.mrb[7].mxu1  ;;  %v836_v38 = vrot.slane %v2240_v43, 4 }
 0x101   : > { %v882_v15 = vrot.slane %v2246_v46, 4 }
 0x104   : > { %747 = vrot.lane.b32.xlu0 %v740_v48, %s2062_s17  ;;  %791 = vrot.lane.b32.xlu1 %v786_v49, %s2064_s19  ;;  %v881_v48 = vrot.slane %v2242_v44, 4 }
 0x105   : > { %v2252_v50 = vpop.f32.mrb[8].mxu0  ;;  %v2254_v51 = vpop.f32.mrb[8].mxu1 }
 0x106   : > { %v2256_v52 = vpop.f32.mrb[9].mxu0  ;;  %v2258_v53 = vpop.f32.mrb[9].mxu1 }
 0x107   : > { %v2260_v54 = vpop.f32.mrb[10].mxu0  ;;  %v2262_v55 = vpop.f32.mrb[10].mxu1 }
 0x108   : > { %771 = vrot.lane.b32.xlu0 %v585_v37, %s2063_s18  ;;  %813 = vrot.lane.b32.xlu1 %v2236_v40, %s2065_s20  ;;  %v2266_v56 = vpop.f32.mrb[11].mxu0  ;;  %v2268_v57 = vpop.f32.mrb[11].mxu1  ;;  %v930_v40 = vrot.slane %v2256_v52, 4  ;;  %s2084_s18 = smov 108  }
 0x10c   : > { %789 = vrot.lane.b32.xlu0 %v785_v58, %s2064_s19  ;;  %817 = vrot.lane.b32.xlu1 %v2238_v41, %s2065_s20  ;;  %v883_v58 = vrot.slane %v2244_v45, 4 }
 0x10d   : > { %v2272_v59 = vpop.f32.mrb[12].mxu0  ;;  %v2274_v60 = vpop.f32.mrb[12].mxu1 }
 0x10e   : > { %v2276_v62 = vpop.f32.mrb[13].mxu0  ;;  %v2278_v63 = vpop.f32.mrb[13].mxu1 }
 0x10f   : > { %v2280_v1 = vpop.f32.mrb[14].mxu0  ;;  %v2282_v2 = vpop.f32.mrb[14].mxu1 }
 0x110   : > { %793 = vrot.lane.b32.xlu0 %v787_v61, %s2064_s19  ;;  %861 = vrot.lane.b32.xlu1 %v2242_v44, %s2066_s23  ;;  %v2286_v3 = vpop.f32.mrb[15].mxu0  ;;  %v2288_v4 = vpop.f32.mrb[15].mxu1  ;;  %v984_v61 = vrot.slane %v2268_v57, 4  ;;  %v884_v44 = vrot.slane %v2248_v47, 4 }
 0x114   : > { %795 = vrot.lane.b32.xlu0 %v788_v5, %s2064_s19  ;;  %865 = vrot.lane.b32.xlu1 %v2244_v45, %s2066_s23  ;;  %s2085_s19 = smov 106  }
 0x115   : > { %v2292_v6 = vpop.f32.mrb[16].mxu0  ;;  %v2294_v7 = vpop.f32.mrb[16].mxu1 }
 0x116   : > { %v2296_v9 = vpop.f32.mrb[17].mxu0  ;;  %v2298_v10 = vpop.f32.mrb[17].mxu1 }
 0x117   : > { %v2300_v11 = vpop.f32.mrb[18].mxu0  ;;  %v2302_v12 = vpop.f32.mrb[18].mxu1 }
 0x118   : > { %815 = vrot.lane.b32.xlu0 %v493_v42, %s2065_s20  ;;  %839 = vrot.lane.b32.xlu1 %v834_v8, %s2067_s24  ;;  %v2306_v13 = vpop.f32.mrb[19].mxu0  ;;  %v2308_v14 = vpop.f32.mrb[19].mxu1 }
 0x11c   : > { %819 = vrot.lane.b32.xlu0 %v2240_v43, %s2065_s20  ;;  %887 = vrot.lane.b32.xlu1 %v882_v15, %s2068_s25  ;;  %v982_v43 = vrot.slane %v2266_v56, 4 }
 0x11d   : > { %v531_v16 = vpop.f32.mrb[20].mxu0  ;;  %v2314_v17 = vpop.f32.mrb[20].mxu1 }
 0x11e   : > { %v2317_v19 = vpop.f32.mrb[21].mxu0  ;;  %v2319_v20 = vpop.f32.mrb[21].mxu1 }
 0x11f   : > { %v534_v21 = vpop.f32.mrb[22].mxu0  ;;  %v2321_v22 = vpop.f32.mrb[22].mxu1 }
 0x120   : > { %837 = vrot.lane.b32.xlu0 %v833_v18, %s2067_s24  ;;  %909 = vrot.lane.b32.xlu1 %v2252_v50, %s2069_s26  ;;  %v2326_v23 = vpop.f32.mrb[23].mxu0  ;;  %v2328_v24 = vpop.f32.mrb[23].mxu1 }
 0x124   : > { %841 = vrot.lane.b32.xlu0 %v835_v25, %s2067_s24  ;;  %913 = vrot.lane.b32.xlu1 %v2254_v51, %s2069_s26  ;;  %v1037_v25 = vrot.slane %v2272_v59, 4 }
 0x125   : > { %v539_v26 = vpop.f32.mrb[24].mxu0  ;;  %v2334_v27 = vpop.f32.mrb[24].mxu1 }
 0x126   : > { %v2336_v28 = vpop.f32.mrb[25].mxu0  ;;  %v2338_v33 = vpop.f32.mrb[25].mxu1  ;;  %v929_v26 = vrot.slane %v2252_v50, 4 }
 0x127   : > { %v542_v34 = vpop.f32.mrb[26].mxu0  ;;  %v643_v35 = vpop.f32.mrb[26].mxu1 }
 0x128   : > { %863 = vrot.lane.b32.xlu0 %v2246_v46, %s2066_s23  ;;  %958 = vrot.lane.b32.xlu1 %v2260_v54, %s2070_s27  ;;  %v543_v36 = vpop.f32.mrb[27].mxu0  ;;  %v644_v37 = vpop.f32.mrb[27].mxu1  ;;  %v1039_v34 = vrot.slane %v2274_v60, 4 }
 0x129   : > { %v931_v36 = vrot.slane %v2254_v51, 4  ;;  %v932_v51 = vrot.slane %v2258_v53, 4 }
 0x12c   : > { %843 = vrot.lane.b32.xlu0 %v836_v38, %s2067_s24  ;;  %962 = vrot.lane.b32.xlu1 %v2262_v55, %s2070_s27 }
 0x12d   : > { %v680_v39 = vpop.f32.mrb[28].mxu0 }
 0x12e   : > { %v1942_v41 = vpop.f32.mrb[29].mxu0  ;;  %v1040_v39 = vrot.slane %v2278_v63, 4 }
 0x12f   : > { %v682_v42 = vpop.f32.mrb[30].mxu0 }
 0x130   : > { %867 = vrot.lane.b32.xlu0 %v2248_v47, %s2066_s23  ;;  %935 = vrot.lane.b32.xlu1 %v930_v40, %s2071_s28  ;;  %v1943_v46 = vpop.f32.mrb[31].mxu0 }
 0x131   : > { %v1093_v46 = vrot.slane %v2280_v1, 4 }
 0x134   : > { %885 = vrot.lane.b32.xlu0 %v881_v48, %s2068_s25  ;;  %988 = vrot.lane.b32.xlu1 %v982_v43, %s2072_s29  ;;  %v983_v43 = vrot.slane %v2262_v55, 4  ;;  %v1038_v55 = vrot.slane %v2276_v62, 4 }
 0x135   : > { %v686_v49 = vpop.f32.mrb[32].mxu0 }
 0x136   : > { %v1946_v5 = vpop.f32.mrb[33].mxu0  ;;  %v1095_v49 = vrot.slane %v2282_v2, 4 }
 0x137   : > { %v688_v8 = vpop.f32.mrb[34].mxu0 }
 0x138   : > { %889 = vrot.lane.b32.xlu0 %v883_v58, %s2068_s25  ;;  %992 = vrot.lane.b32.xlu1 %v984_v61, %s2072_s29  ;;  %v1947_v15 = vpop.f32.mrb[35].mxu0 }
 0x13c   : > { %891 = vrot.lane.b32.xlu0 %v884_v44, %s2068_s25  ;;  %1014 = vrot.lane.b32.xlu1 %v2272_v59, %s2073_s30  ;;  %v1151_v44 = vrot.slane %v2294_v7, 4 }
 0x13d   : > { %v692_v16 = vpop.f32.mrb[36].mxu0 }
 0x13e   : > { %v1950_v18 = vpop.f32.mrb[37].mxu0 }
 0x13f   : > { %v2364_v45 = vpop.f32.mrb[38].mxu0 }
 0x140   : > { %911 = vrot.lane.b32.xlu0 %v2256_v52, %s2069_s26  ;;  %1018 = vrot.lane.b32.xlu1 %v2274_v60, %s2073_s30  ;;  %v1951_v21 = vpop.f32.mrb[39].mxu0 }
 0x144   : > { %915 = vrot.lane.b32.xlu0 %v2258_v53, %s2069_s26  ;;  %1042 = vrot.lane.b32.xlu1 %v1037_v25, %s2074_s7  ;;  %v981_v53 = vrot.slane %v2260_v54, 4 }
 0x145   : > { %v2374_v47 = vpop.f32.mrb[40].mxu0 }
 0x146   : > { %v1954_v35 = vpop.f32.mrb[41].mxu0 }
 0x147   : > { %v2378_v52 = vpop.f32.mrb[42].mxu0 }
 0x148   : > { %933 = vrot.lane.b32.xlu0 %v929_v26, %s2071_s28  ;;  %1046 = vrot.lane.b32.xlu1 %v1039_v34, %s2074_s7  ;;  %v1955_v59 = vpop.f32.mrb[43].mxu0  ;;  %v1206_v26 = vrot.slane %v2306_v13, 4 }
 0x149   : > { %v1207_v59 = vrot.slane %v2302_v12, 4 }
 0x14c   : > { %937 = vrot.lane.b32.xlu0 %v931_v36, %s2071_s28  ;;  %1070 = vrot.lane.b32.xlu1 %v2280_v1, %s2075_s8  ;;  %v1096_v1 = vrot.slane %v2288_v4, 4 }
 0x14d   : > { %v2386_v37 = vpop.f32.mrb[44].mxu0 }
 0x14e   : > { %v1958_v50 = vpop.f32.mrb[45].mxu0 }
 0x14f   : > { %v2388_v60 = vpop.f32.mrb[46].mxu0 }
 0x150   : > { %960 = vrot.lane.b32.xlu0 %v2266_v56, %s2070_s27  ;;  %1074 = vrot.lane.b32.xlu1 %v2282_v2, %s2075_s8  ;;  %v1959_v38 = vpop.f32.mrb[47].mxu0 }
 0x154   : > { %939 = vrot.lane.b32.xlu0 %v932_v51, %s2071_s28  ;;  %1048 = vrot.lane.b32.xlu1 %v1040_v39, %s2074_s7 }
 0x155   : > { %v2398_v40 = vpop.f32.mrb[48].mxu0 }
 0x156   : > { %v1962_v41 = vpop.f32.mrb[49].mxu0 }
 0x157   : > { %v2400_v42 = vpop.f32.mrb[50].mxu0  ;;  %v1257_v41 = vrot.slane %v2317_v19, 4 }
 0x158   : > { %964 = vrot.lane.b32.xlu0 %v2268_v57, %s2070_s27  ;;  %1076 = vrot.lane.b32.xlu1 %v2288_v4, %s2075_s8  ;;  %v1963_v56 = vpop.f32.mrb[51].mxu0 }
 0x159   : > { %v1306_v56 = vrot.slane %v2321_v22, 4 }
 0x15c   : > { %986 = vrot.lane.b32.xlu0 %v981_v53, %s2072_s29  ;;  %1098 = vrot.lane.b32.xlu1 %v1093_v46, %s2076_s9 }
 0x15d   : > { %v2410_v48 = vpop.f32.mrb[52].mxu0 }
 0x15e   : > { %v1966_v57 = vpop.f32.mrb[53].mxu0 }
 0x15f   : > { %v726_v58 = vpop.f32.mrb[54].mxu0 }
 0x160   : > { %990 = vrot.lane.b32.xlu0 %v983_v43, %s2072_s29  ;;  %1102 = vrot.lane.b32.xlu1 %v1095_v49, %s2076_s9  ;;  %v1967_v54 = vpop.f32.mrb[55].mxu0  ;;  %v1259_v43 = vrot.slane %v2319_v20, 4 }
 0x161   : > { %v985_v54 = vrot.slane %v2364_v45, 4 }
 0x164   : > { %1016 = vrot.lane.b32.xlu0 %v2276_v62, %s2073_s30  ;;  %1104 = vrot.lane.b32.xlu1 %v1096_v1, %s2076_s9  ;;  %v1094_v62 = vrot.slane %v2286_v3, 4 }
 0x168   : > { %1020 = vrot.lane.b32.xlu0 %v2278_v63, %s2073_s30  ;;  %1126 = vrot.lane.b32.xlu1 %v2292_v6, %s2077_s10  ;;  %v1149_v63 = vrot.slane %v2292_v6, 4 }
 0x16a   : > { %v2425_v2 = vpop.permute.xlu1 %745  ;;  %v2427_v61 = vpop.permute.xlu0 %741 }
 0x16c   : > { %1044 = vrot.lane.b32.xlu0 %v1038_v55, %s2074_s7  ;;  %1130 = vrot.lane.b32.xlu1 %v2294_v7, %s2077_s10 }
 0x16e   : > { %v2432_v4 = vpop.permute.xlu0 %743  ;;  %v2434_v5 = vpop.permute.xlu1 %765 }
 0x170   : > { %1072 = vrot.lane.b32.xlu0 %v2286_v3, %s2075_s8  ;;  %1132 = vrot.lane.b32.xlu1 %v2298_v10, %s2077_s10  ;;  %v1150_v3 = vrot.slane %v2296_v9, 4 }
 0x172   : > { %v2442_v8 = vpop.permute.xlu1 %769  ;;  %v2444_v15 = vpop.permute.xlu0 %767 }
 0x174   : > { %1100 = vrot.lane.b32.xlu0 %v1094_v62, %s2076_s9  ;;  %1154 = vrot.lane.b32.xlu1 %v1149_v63, %s2078_s11  ;;  %v1097_v63 = vrot.slane %v2378_v52, 4 }
 0x176   : > { %v2449_v16 = vpop.permute.xlu0 %747  ;;  %v2451_v18 = vpop.permute.xlu1 %791 }
 0x178   : > { %1158 = vrot.lane.b32.xlu1 %v1151_v44, %s2078_s11  ;;  %1128 = vrot.lane.b32.xlu0 %v2296_v9, %s2077_s10  ;;  %v1205_v9 = vrot.slane %v2300_v11, 4 }
 0x17a   : > { %v2457_v6 = vpop.permute.xlu0 %771  ;;  %v2459_v21 = vpop.permute.xlu1 %813 }
 0x17c   : > { %1156 = vrot.lane.b32.xlu0 %v1150_v3, %s2078_s11  ;;  %1182 = vrot.lane.b32.xlu1 %v2300_v11, %s2079_s12  ;;  %v1258_v11 = vrot.slane %v2314_v17, 4 }
 0x17e   : > { %v2464_v7 = vpop.permute.xlu0 %789  ;;  %v2466_v25 = vpop.permute.xlu1 %817 }
 0x180   : > { %1186 = vrot.lane.b32.xlu1 %v2302_v12, %s2079_s12  ;;  %1184 = vrot.lane.b32.xlu0 %v2306_v13, %s2079_s12 }
 0x182   : > { %v2474_v34 = vpop.permute.xlu0 %793  ;;  %v2476_v35 = vpop.permute.xlu1 %861 }
 0x184   : > { %1210 = vrot.lane.b32.xlu1 %v1205_v9, %s2080_s13  ;;  %1212 = vrot.lane.b32.xlu0 %v1206_v26, %s2080_s13 }
 0x186   : > { %v2481_v36 = vpop.permute.xlu0 %795  ;;  %v2483_v50 = vpop.permute.xlu1 %865 }
 0x188   : > { %1214 = vrot.lane.b32.xlu1 %v1207_v59, %s2080_s13  ;;  %1239 = vrot.lane.b32.xlu0 %v2314_v17, %s2081_s14 }
 0x18a   : > { %v2489_v13 = vpop.permute.xlu0 %815  ;;  %v2491_v38 = vpop.permute.xlu1 %839 }
 0x18c   : > { %1263 = vrot.lane.b32.xlu0 %v1258_v11, %s2082_s15  ;;  %1237 = vrot.lane.b32.xlu1 %v2317_v19, %s2081_s14  ;;  %v1305_v19 = vrot.slane %v2326_v23, 4  ;;  %v776_v11 = vsel %vm773_vm3, %v2442_v8, %v2457_v6 }
 0x18e   : > { %v2496_v12 = vpop.permute.xlu0 %819  ;;  %v2498_v51 = vpop.permute.xlu1 %887 }
 0x190   : > { %1241 = vrot.lane.b32.xlu1 %v2319_v20, %s2081_s14  ;;  %1285 = vrot.lane.b32.xlu0 %v2326_v23, %s2083_s16  ;;  %v1307_v20 = vrot.slane %v2328_v24, 4  ;;  %v1041_v23 = vrot.slane %v2374_v47, 4 }
 0x192   : > { %v2504_v17 = vpop.permute.xlu0 %837  ;;  %v2506_v39 = vpop.permute.xlu1 %909 }
 0x194   : > { %1287 = vrot.lane.b32.xlu1 %v2321_v22, %s2083_s16  ;;  %1289 = vrot.lane.b32.xlu0 %v2328_v24, %s2083_s16 }
 0x196   : > { %v2514_v53 = vpop.permute.xlu0 %841  ;;  %v2516_v46 = vpop.permute.xlu1 %913 }
 0x198   : > { %1261 = vrot.lane.b32.xlu1 %v1257_v41, %s2082_s15  ;;  %1311 = vrot.lane.b32.xlu0 %v1306_v56, %s2084_s18  ;;  %v800_v56 = vsel %vm797_vm4, %v2474_v34, %v2481_v36 }
 0x19a   : > { %v2521_v49 = vpop.permute.xlu0 %863  ;;  %v2523_v57 = vpop.permute.xlu1 %958 }
 0x19c   : > { %1265 = vrot.lane.b32.xlu1 %v1259_v43, %s2082_s15  ;;  %1333 = vrot.lane.b32.xlu0 %v2336_v28, %s2085_s19 }
 0x19e   : > { %v844_v22 = vpop.permute.xlu0 %843  ;;  %v2529_v58 = vpop.permute.xlu1 %962 }
 0x1a0   : > { %1309 = vrot.lane.b32.xlu1 %v1305_v19, %s2084_s18  ;;  %1337 = vrot.lane.b32.xlu0 %v2338_v33, %s2085_s19 }
 0x1a2   : > { %v868_v1 = vpop.permute.xlu0 %867  ;;  %v2536_v55 = vpop.permute.xlu1 %935 }
 0x1a4   : > { %1313 = vrot.lane.b32.xlu1 %v1307_v20, %s2084_s18  ;;  %994 = vrot.lane.b32.xlu0 %v985_v54, %s2072_s29  ;;  %v824_v20 = vsel %vm821_vm5, %v2466_v25, %v2496_v12 }
 0x1a6   : > { %v2541_v28 = vpop.permute.xlu0 %885  ;;  %v2543_v62 = vpop.permute.xlu1 %988 }
 0x1a8   : > { %1335 = vrot.lane.b32.xlu1 %v2334_v27, %s2085_s19  ;;  %1050 = vrot.lane.b32.xlu0 %v1041_v23, %s2074_s7  ;;  %v1152_v27 = vrot.slane %v2298_v10, 4  ;;  %v760_v10 = vadd.f32 %v2449_v16, %v2226_v31  ;;  %v1208_v31 = vrot.slane %v2308_v14, 4 }
 0x1aa   : > { %v2548_v24 = vpop.permute.xlu0 %889  ;;  %v2550_v33 = vpop.permute.xlu1 %992 }
 0x1ac   : > { %966 = vrot.lane.b32.xlu1 %v2364_v45, %s2070_s27  ;;  %1078 = vrot.lane.b32.xlu0 %v2378_v52, %s2075_s8  ;;  %v752_v45 = vsel %vm2971_vm2, %v2425_v2, %v2449_v16 }
 0x1ad   : > { %v759_v41 = vadd.f32 %v752_v45, %v2224_v30 }
 0x1ae   : > { %v892_v44 = vpop.permute.xlu0 %891  ;;  %v2557_v3 = vpop.permute.xlu1 %1014 }
 0x1af   : > { %v783_v16 = vadd.f32 %v776_v11, %v759_v41  ;;  %v1260_v11 = vrot.slane %v2398_v40, 4 }
 0x1b0   : > { %1022 = vrot.lane.b32.xlu1 %v2374_v47, %s2073_s30  ;;  %1106 = vrot.lane.b32.xlu0 %v1097_v63, %s2076_s9  ;;  %v1153_v47 = vrot.slane %v2386_v37, 4 }
 0x1b1   : > { %v807_v54 = vadd.f32 %v800_v56, %v783_v16 }
 0x1b2   : > { %v2563_v9 = vpop.permute.xlu0 %911  ;;  %v2565_v26 = vpop.permute.xlu1 %1018 }
 0x1b3   : > { %v831_v23 = vadd.f32 %v824_v20, %v807_v54 }
 0x1b4   : > { %1160 = vrot.lane.b32.xlu1 %v1152_v27, %s2078_s11  ;;  %1134 = vrot.lane.b32.xlu0 %v2386_v37, %s2077_s10  ;;  %v784_v37 = vadd.f32 %v2457_v6, %v760_v10  ;;  %v848_v6 = vsel %vm2970_vm6, %v2514_v53, %v844_v22  ;;  %s2086_s10 = smov 127  }
 0x1b5   : > { %v855_v10 = vadd.f32 %v848_v6, %v831_v23 }
 0x1b6   : > { %v916_v52 = vpop.permute.xlu0 %915  ;;  %v2574_v59 = vpop.permute.xlu1 %1042  ;;  %v808_v30 = vadd.f32 %v2481_v36, %v784_v37  ;;  %v1209_v36 = vrot.slane %v2388_v60, 4 }
 0x1b8   : > { %1188 = vrot.lane.b32.xlu1 %v2308_v14, %s2079_s12  ;;  %1162 = vrot.lane.b32.xlu0 %v1153_v47, %s2078_s11  ;;  %v832_v14 = vadd.f32 %v2496_v12, %v808_v30  ;;  %v872_v47 = vsel %vm2969_vm7, %v2483_v50, %v868_v1  ;;  %v1308_v30 = vrot.slane %v2400_v42, 4  ;;  %s2087_s11 = smov 104  }
 0x1b9   : > { %v879_v41 = vadd.f32 %v872_v47, %v855_v10 }
 0x1ba   : > { %v2590_v43 = vpop.permute.xlu0 %933  ;;  %v2592_v19 = vpop.permute.xlu1 %1046  ;;  %v856_v45 = vadd.f32 %v844_v22, %v832_v14  ;;  %v751_v14 = vsel %vm2971_vm2, %v2432_v4, %v2425_v2 }
 0x1bc   : > { %1216 = vrot.lane.b32.xlu1 %v1208_v31, %s2080_s13  ;;  %1190 = vrot.lane.b32.xlu0 %v2388_v60, %s2079_s12  ;;  %v880_v12 = vadd.f32 %v868_v1, %v856_v45  ;;  %v896_v60 = vsel %vm893_vm8, %v2548_v24, %v892_v44  ;;  %v920_v31 = vsel %vm917_vm9, %v2516_v46, %v916_v52  ;;  %s2088_s12 = smov 103  }
 0x1bd   : > { %v903_v16 = vadd.f32 %v896_v60, %v879_v41  ;;  %v871_v60 = vsel %vm2969_vm7, %v2521_v49, %v2483_v50 }
 0x1be   : > { %v2605_v63 = vpop.permute.xlu0 %937  ;;  %v2607_v27 = vpop.permute.xlu1 %1070  ;;  %v904_v56 = vadd.f32 %v892_v44, %v880_v12  ;;  %v750_v44 = vsel %vm2971_vm2, %v2427_v61, %v2432_v4  ;;  %v775_v61 = vsel %vm773_vm3, %v2444_v15, %v2442_v8  ;;  %v758_v4 = vadd.f32 %v751_v14, %v2228_v32 }
 0x1bf   : > { %v927_v1 = vadd.f32 %v920_v31, %v903_v16  ;;  %v757_v2 = vadd.f32 %v750_v44, %v2222_v29  ;;  %v822_v29 = vsel %vm821_vm5, %v2459_v21, %v2489_v13  ;;  %v823_v32 = vsel %vm821_vm5, %v2489_v13, %v2466_v25 }
 0x1c0   : > { %1218 = vrot.lane.b32.xlu0 %v1209_v36, %s2080_s13  ;;  %1243 = vrot.lane.b32.xlu1 %v2398_v40, %s2081_s14  ;;  %v928_v40 = vadd.f32 %v916_v52, %v904_v56  ;;  %v782_v10 = vadd.f32 %v775_v61, %v758_v4  ;;  %v870_v13 = vsel %vm2969_vm7, %v2476_v35, %v2521_v49  ;;  %vm1220_vm5 = vcmask 211968   ;;  %s2089_s13 = smov 102   ;;  %s2090_s14 = smov 79  }
 0x1c1   : > { %v895_v16 = vsel %vm893_vm8, %v2498_v51, %v2548_v24  ;;  %v943_v24 = vsel %vm941_vm10, %v2536_v55, %v2605_v63  ;;  %vm1317_vm7 = vcmask 883712   ;;  %vm1411_vm2 = vcmask 1041408  }
 0x1c2   : > { %v2617_v37 = vpop.permute.xlu0 %960  ;;  %v2619_v22 = vpop.permute.xlu1 %1074 }
 0x1c4   : > { %1267 = vrot.lane.b32.xlu0 %v1260_v11, %s2082_s15  ;;  %1291 = vrot.lane.b32.xlu1 %v2400_v42, %s2083_s16  ;;  %v774_v42 = vsel %vm773_vm3, %v2434_v5, %v2444_v15  ;;  %v799_v5 = vsel %vm797_vm4, %v2451_v18, %v2474_v34  ;;  %vm1164_vm3 = vcmask 236544  }
 0x1c5   : > { %v781_v47 = vadd.f32 %v774_v42, %v757_v2  ;;  %v806_v15 = vadd.f32 %v799_v5, %v782_v10 }
 0x1c6   : > { %v940_v20 = vpop.permute.xlu0 %939  ;;  %v2627_v54 = vpop.permute.xlu1 %1048 }
 0x1c7   : > { %v944_v6 = vsel %vm941_vm10, %v2605_v63, %v940_v20  ;;  %v2637_v23 = vadd.f32 %v940_v20, %v928_v40  ;;  %v830_v25 = vadd.f32 %v823_v32, %v806_v15 }
 0x1c8   : > { %v951_v52 = vadd.f32 %v944_v6, %v927_v1  ;;  %1315 = vrot.lane.b32.xlu0 %v1308_v30, %s2084_s18  ;;  %1339 = vrot.lane.b32.xlu1 %v2410_v48, %s2085_s19  ;;  %v798_v48 = vsel %vm797_vm4, %v2464_v7, %v2451_v18  ;;  %v846_v18 = vsel %vm2970_vm6, %v2504_v17, %v2491_v38  ;;  %vm1192_vm4 = vcmask 228352  }
 0x1c9   : > { %v805_v8 = vadd.f32 %v798_v48, %v781_v47  ;;  %v847_v7 = vsel %vm2970_vm6, %v2491_v38, %v2514_v53  ;;  %v894_v53 = vsel %vm893_vm8, %v2541_v28, %v2498_v51  ;;  %v918_v1 = vsel %vm917_vm9, %v2506_v39, %v2563_v9  ;;  %v1726_v39 = vld [vmem:[%s2965_s3] sm:$0xf] }
 0x1ca   : > { %v2650_v36 = vpop.permute.xlu0 %964  ;;  %v2652_v45 = vpop.permute.xlu1 %1076  ;;  %v854_v17 = vadd.f32 %v847_v7, %v830_v25  ;;  %v919_v30 = vsel %vm917_vm9, %v2563_v9, %v2516_v46  ;;  %v942_v51 = vsel %vm941_vm10, %v2590_v43, %v2536_v55  ;;  %v969_v46 = vsel %vm968_vm11, %v2523_v57, %v2617_v37 }
 0x1cb   : > { %v971_v21 = vsel %vm968_vm11, %v2529_v58, %v2650_v36  ;;  %v829_v34 = vadd.f32 %v822_v29, %v805_v8  ;;  %v970_v9 = vsel %vm968_vm11, %v2617_v37, %v2529_v58  ;;  %v1055_v48 = vsel %vm1052_vm13, %v2592_v19, %v2627_v54 }
 0x1cc   : > { %v979_v56 = vadd.f32 %v971_v21, %v951_v52  ;;  %v878_v50 = vadd.f32 %v871_v60, %v854_v17  ;;  %1729 = vperm.xlu1 %2011, %v1726_v39   ;;  %v1083_v15 = vsel %vm1080_vm15, %v2619_v22, %v2652_v45  ;;  %vm1245_vm8 = vcmask 916480  }
 0x1cd   : > { %v853_v41 = vadd.f32 %v846_v18, %v829_v34  ;;  %vm1269_vm9 = vcmask 900096   ;;  %vm1293_vm10 = vcmask 891904   ;;  %vm1341_vm6 = vcmask 867328  }
 0x1ce   : > { %v987_v11 = vpop.permute.xlu0 %986  ;;  %v2666_v12 = vpop.permute.xlu1 %1098  ;;  %v902_v28 = vadd.f32 %v895_v16, %v878_v50 }
 0x1cf   : > { %v877_v40 = vadd.f32 %v870_v13, %v853_v41  ;;  %v997_v61 = vsel %vm996_vm12, %v987_v11, %v2543_v62 }
 0x1d0   : > { %v926_v52 = vadd.f32 %v919_v30, %v902_v28 }
 0x1d1   : > { %v901_v20 = vadd.f32 %v894_v53, %v877_v40 }
 0x1d2   : > { %v991_v31 = vpop.permute.xlu0 %990  ;;  %v2683_v38 = vpop.permute.xlu1 %1102  ;;  %v950_v42 = vadd.f32 %v943_v24, %v926_v52 }
 0x1d3   : > { %v999_v35 = vsel %vm996_vm12, %v991_v31, %v2550_v33  ;;  %v925_v6 = vadd.f32 %v918_v1, %v901_v20  ;;  %v998_v2 = vsel %vm996_vm12, %v2543_v62, %v991_v31 }
 0x1d4   : > { %v1007_v49 = vadd.f32 %v999_v35, %v979_v56  ;;  %v978_v58 = vadd.f32 %v970_v9, %v950_v42 }
 0x1d5   : > { %v949_v43 = vadd.f32 %v942_v51, %v925_v6 }
 0x1d6   : > { %v1017_v44 = vpop.permute.xlu0 %1016  ;;  %v2699_v14 = vpop.permute.xlu1 %1104  ;;  %v1006_v62 = vadd.f32 %v998_v2, %v978_v58 }
 0x1d7   : > { %v977_v4 = vadd.f32 %v969_v46, %v949_v43  ;;  %v1025_v5 = vsel %vm1024_vm14, %v2557_v3, %v1017_v44  ;;  %v1026_v47 = vsel %vm1024_vm14, %v1017_v44, %v2565_v26 }
 0x1d8   : > { %v1034_v7 = vadd.f32 %v1026_v47, %v1006_v62 }
 0x1d9   : > { %v1005_v10 = vadd.f32 %v997_v61, %v977_v4 }
 0x1da   : > { %v2716_v55 = vpop.permute.xlu0 %1020  ;;  %v1127_v63 = vpop.permute.xlu1 %1126 }
 0x1db   : > { %v1027_v57 = vsel %vm1024_vm14, %v2565_v26, %v2716_v55  ;;  %v1033_v3 = vadd.f32 %v1025_v5, %v1005_v10  ;;  %v1111_v26 = vsel %vm1108_vm0, %v2683_v38, %v2699_v14 }
 0x1dc   : > { %v1035_v37 = vadd.f32 %v1027_v57, %v1007_v49 }
 0x1de   : > { %v1063_v29 = vadd.f32 %v1055_v48, %v1035_v37  ;;  %v1045_v32 = vpop.permute.xlu0 %1044  ;;  %v1131_v8 = vpop.permute.xlu1 %1130 }
 0x1df   : > { %v1053_v11 = vsel %vm1052_vm13, %v2574_v59, %v1045_v32  ;;  %v1054_v18 = vsel %vm1052_vm13, %v1045_v32, %v2592_v19 }
 0x1e0   : > { %v1091_v21 = vadd.f32 %v1083_v15, %v1063_v29  ;;  %v1061_v34 = vadd.f32 %v1053_v11, %v1033_v3  ;;  %v1062_v25 = vadd.f32 %v1054_v18, %v1034_v7  ;;  %v1355_v18 = vlaneseq }
 0x1e2   : > { %v1073_v13 = vpop.permute.xlu0 %1072  ;;  %v1119_v60 = vadd.f32 %v1111_v26, %v1091_v21  ;;  %v2742_v41 = vpop.permute.xlu1 %1132 }
 0x1e3   : > { %v1081_v59 = vsel %vm1080_vm15, %v2607_v27, %v1073_v13  ;;  %v1082_v19 = vsel %vm1080_vm15, %v1073_v13, %v2619_v22  ;;  %v1139_v17 = vsel %vm1136_vm1, %v1131_v8, %v2742_v41 }
 0x1e4   : > { %v1089_v56 = vadd.f32 %v1081_v59, %v1061_v34  ;;  %v1090_v31 = vadd.f32 %v1082_v19, %v1062_v25  ;;  %v2750_v53 = vadd.f32 %v1139_v17, %v1119_v60  ;;  %v2788_v17 = vshrl.u32 %v1355_v18, 7 }
 0x1e6   : > { %v1101_v16 = vpop.permute.xlu0 %1100  ;;  %v1155_v35 = vpop.permute.xlu1 %1154 }
 0x1e7   : > { %v1109_v39 = vsel %vm1108_vm0, %v2666_v12, %v1101_v16  ;;  %v1110_v46 = vsel %vm1108_vm0, %v1101_v16, %v2683_v38 }
 0x1e8   : > { %v1117_v2 = vadd.f32 %v1109_v39, %v1089_v56  ;;  %v1118_v57 = vadd.f32 %v1110_v46, %v1090_v31 }
 0x1ea   : > { %v2752_v40 = vpop.permute.xlu1 %1158  ;;  %v1129_v50 = vpop.permute.xlu0 %1128 }
 0x1eb   : > { %v1137_v42 = vsel %vm1136_vm1, %v1127_v63, %v1129_v50  ;;  %v1138_v61 = vsel %vm1136_vm1, %v1129_v50, %v1131_v8  ;;  %v1357_v50 = vsub.s32 0, %v2788_v17 }
 0x1ec   : > { %v1145_v12 = vadd.f32 %v1137_v42, %v1117_v2  ;;  %v1146_v37 = vadd.f32 %v1138_v61, %v1118_v57 }
 0x1ee   : > { %v1157_v49 = vpop.permute.xlu0 %1156  ;;  %v1183_v1 = vpop.permute.xlu1 %1182 }
 0x1ef   : > { %v1165_v4 = vsel %vm1164_vm3, %v1155_v35, %v1157_v49  ;;  %v1166_v58 = vsel %vm1164_vm3, %v1157_v49, %v2752_v40  ;;  %v1361_v49 = vsub.s32 1, %v2788_v17 }
 0x1f0   : > { %v1173_v47 = vadd.f32 %v1165_v4, %v1145_v12  ;;  %v1174_v10 = vadd.f32 %v1166_v58, %v1146_v37 }
 0x1f2   : > { %v2754_v30 = vpop.permute.xlu1 %1186  ;;  %v1185_v27 = vpop.permute.xlu0 %1184 }
 0x1f3   : > { %v1193_v5 = vsel %vm1192_vm4, %v1183_v1, %v1185_v27  ;;  %v1194_v63 = vsel %vm1192_vm4, %v1185_v27, %v2754_v30 }
 0x1f4   : > { %v1201_v32 = vadd.f32 %v1193_v5, %v1173_v47  ;;  %v1202_v8 = vadd.f32 %v1194_v63, %v1174_v10 }
 0x1f6   : > { %v1211_v20 = vpop.permute.xlu1 %1210  ;;  %v1213_v28 = vpop.permute.xlu0 %1212 }
 0x1f7   : > { %v1221_v62 = vsel %vm1220_vm5, %v1211_v20, %v1213_v28 }
 0x1f8   : > { %v1229_v21 = vadd.f32 %v1221_v62, %v1201_v32 }
 0x1fa   : > { %v2756_v22 = vpop.permute.xlu1 %1214  ;;  %v1240_v44 = vpop.permute.xlu0 %1239 }
 0x1fb   : > { %v1222_v29 = vsel %vm1220_vm5, %v1213_v28, %v2756_v22 }
 0x1fc   : > { %v1230_v26 = vadd.f32 %v1222_v29, %v1202_v8 }
 0x1fe   : > { %v1264_v51 = vpop.permute.xlu0 %1263  ;;  %v1238_v24 = vpop.permute.xlu1 %1237 }
 0x1ff   : > { %v1246_v3 = vsel %vm1245_vm8, %v1238_v24, %v1240_v44 }
 0x200   : > { %v1253_v13 = vadd.f32 %v1246_v3, %v1229_v21  ;;  %v2820_v3 = vld [vmem:[%s2964_s2] sm:$0xff]  }
 0x202   : > { %v2758_v6 = vpop.permute.xlu1 %1241  ;;  %v1286_v52 = vpop.permute.xlu0 %1285 }
 0x203   : > { %v1247_v7 = vsel %vm1245_vm8, %v1240_v44, %v2758_v6  ;;  %v2803_v44 = vld [vmem:[%s2967_s5] sm:$0xf] }
 0x204   : > { %v1254_v60 = vadd.f32 %v1247_v7, %v1230_v26  ;;  %v1362_v42 = vrot.slane %v2803_v44, %v1361_v49 }
 0x206   : > { %v1288_v9 = vpop.permute.xlu1 %1287  ;;  %v2764_v43 = vpop.permute.xlu0 %1289 }
 0x207   : > { %v1294_v1 = vsel %vm1293_vm10, %v1286_v52, %v1288_v9  ;;  %v1295_v27 = vsel %vm1293_vm10, %v1288_v9, %v2764_v43  ;;  %v1358_v52 = vrot.slane %v2803_v44, %v1357_v50 }
 0x20a   : > { %v1262_v38 = vpop.permute.xlu1 %1261  ;;  %v1312_v48 = vpop.permute.xlu0 %1311 }
 0x20b   : > { %v1270_v34 = vsel %vm1269_vm9, %v1262_v38, %v1264_v51 }
 0x20c   : > { %v1277_v56 = vadd.f32 %v1270_v34, %v1253_v13 }
 0x20e   : > { %v2777_v15 = vpop.permute.xlu1 %1265  ;;  %v1334_v11 = vpop.permute.xlu0 %1333 }
 0x20f   : > { %v1271_v25 = vsel %vm1269_vm9, %v1264_v51, %v2777_v15  ;;  %v1301_v51 = vadd.f32 %v1294_v1, %v1277_v56 }
 0x210   : > { %v1278_v31 = vadd.f32 %v1271_v25, %v1254_v60 }
 0x212   : > { %v1310_v59 = vpop.permute.xlu1 %1309  ;;  %v2785_v19 = vpop.permute.xlu0 %1337  ;;  %v1302_v24 = vadd.f32 %v1295_v27, %v1278_v31  ;;  %v2049_v31 = vld [vmem:[%s2964_s2 + $0x8] sm:$0xff]  }
 0x213   : > { %v1318_v20 = vsel %vm1317_vm7, %v1310_v59, %v1312_v48 }
 0x214   : > { %v1325_v39 = vadd.f32 %v1318_v20, %v1301_v51 }
 0x216   : > { %v2790_v16 = vpop.permute.xlu1 %1313  ;;  %v995_v35 = vpop.permute.xlu0 %994 }
 0x217   : > { %v1319_v28 = vsel %vm1317_vm7, %v1312_v48, %v2790_v16  ;;  %v1000_v62 = vsel %vm996_vm12, %v2550_v33, %v995_v35  ;;  %vm1630_vm12 = vcmask 842752  }
 0x218   : > { %v1326_v46 = vadd.f32 %v1319_v28, %v1302_v24  ;;  %v2050_v24 = vld [vmem:[%s2964_s2 + $0x10] ss:$0 sps:$4 sm:$0x33]  }
 0x21a   : > { %v1336_v9 = vpop.permute.xlu1 %1335  ;;  %v1051_v61 = vpop.permute.xlu0 %1050 }
 0x21b   : > { %v1342_v2 = vsel %vm1341_vm6, %v1334_v11, %v1336_v9  ;;  %v1343_v57 = vsel %vm1341_vm6, %v1336_v9, %v2785_v19  ;;  %v1056_v33 = vsel %vm1052_vm13, %v2627_v54, %v1051_v61  ;;  %vm1652_vm13 = vcmask 834560  }
 0x21c   : > { %v1349_v4 = vadd.f32 %v1342_v2, %v1325_v39  ;;  %v1350_v58 = vadd.f32 %v1343_v57, %v1326_v46 }
 0x21e   : > { %v1375_v12 = vmul.f32 %v1358_v52, %v1349_v4  ;;  %v1376_v37 = vmul.f32 %v1362_v42, %v1350_v58  ;;  %v967_v38 = vpop.permute.xlu1 %966  ;;  %v1079_v48 = vpop.permute.xlu0 %1078  ;;  %v1365_v58 = vsub.s32 2, %v2788_v17 }
 0x21f   : > { %v972_v5 = vsel %vm968_vm11, %v2650_v36, %v967_v38  ;;  %vm1401_vm11 = vcmask 31744   ;;  %v1084_v34 = vsel %vm1080_vm15, %v2652_v45, %v1079_v48  ;;  %vm2973_vm15 = vcmask 654336  }
 0x220   : > { %v1379_v63 = vpack.c.bf16 %v1375_v12, %v1375_v12  ;;  %v1380_v47 = vpack.c.bf16 %v1376_v37, %v1376_v37  ;;  %v980_v10 = vadd.f32 %v972_v5, %v2637_v23  ;;  %v1369_v12 = vsub.s32 3, %v2788_v17 }
 0x222   : > { %1911 = vmatprep.subr.msk.bf16.mxu1 %vm1411_vm2, %v1380_v47  ;;  %v1008_v29 = vadd.f32 %v1000_v62, %v980_v10  ;;  %v1023_v32 = vpop.permute.xlu1 %1022  ;;  %v1107_v8 = vpop.permute.xlu0 %1106  ;;  %v1413_v11 = vsel %vm1411_vm2, %v1379_v63, 0  ;;  %v1366_v10 = vrot.slane %v2803_v44, %v1365_v58  ;;  %v1370_v62 = vrot.slane %v2803_v44, %v1369_v12 }
 0x223   : > { %v1028_v36 = vsel %vm1024_vm14, %v2716_v55, %v1023_v32  ;;  %1425 = vmatpush1.bf16.msra.mxu1 %v1413_v11  ;;  %v1112_v54 = vsel %vm1108_vm0, %v2699_v14, %v1107_v8  ;;  %vm1695_vm14 = vcmask 646144   ;;  %vm2974_vm0 = vcmask 637952  }
 0x224   : > { %v1036_v23 = vadd.f32 %v1028_v36, %v1008_v29 }
 0x226   : > { %v1064_v7 = vadd.f32 %v1056_v33, %v1036_v23  ;;  %1912 = vmatmul.mubr.msk.bf16.vlgmr.msra.gmra.mrb[28].mxu1 %vm1401_vm11, %v2820_v3  ;;  %v1161_v21 = vpop.permute.xlu1 %1160  ;;  %v1135_v26 = vpop.permute.xlu0 %1134 }
 0x227   : > { %v1167_v25 = vsel %vm1164_vm3, %v2752_v40, %v1161_v21  ;;  %1466 = vmatprep.mubr.bf16.mxu1 %v2059_v0  ;;  %v1140_v45 = vsel %vm1136_vm1, %v2742_v41, %v1135_v26 }
 0x228   : > { %v1092_v55 = vadd.f32 %v1084_v34, %v1064_v7  ;;  %v1175_v13 = vadd.f32 %v1167_v25, %v2750_v53 }
 0x22a   : > { %v1120_v60 = vadd.f32 %v1112_v54, %v1092_v55  ;;  %v1189_v59 = vpop.permute.xlu1 %1188  ;;  %v1163_v56 = vpop.permute.xlu0 %1162 }
 0x22b   : > { %v1168_v40 = vsel %vm1164_vm3, %v1161_v21, %v1163_v56  ;;  %v1195_v14 = vsel %vm1192_vm4, %v2754_v30, %v1189_v59 }
 0x22c   : > { %v1148_v35 = vadd.f32 %v1140_v45, %v1120_v60  ;;  %v1203_v20 = vadd.f32 %v1195_v14, %v1175_v13 }
 0x22e   : > { %v1176_v50 = vadd.f32 %v1168_v40, %v1148_v35  ;;  %v1217_v49 = vpop.permute.xlu1 %1216  ;;  %v1191_v1 = vpop.permute.xlu0 %1190  ;;  %1913 = vmatmul.mubr.msk.bf16.gmra.mrb[32].mxu1 %vm1401_vm11, %v2049_v31 }
 0x22f   : > { %v1196_v53 = vsel %vm1192_vm4, %v1189_v59, %v1191_v1  ;;  %1476 = vmatprep.mubr.bf16.mxu1 %v2059_v0  ;;  %v1223_v27 = vsel %vm1220_vm5, %v2756_v22, %v1217_v49  ;;  %vm2977_vm4 = vmmov %vm2973_vm15 }
 0x230   : > { %v1204_v41 = vadd.f32 %v1196_v53, %v1176_v50  ;;  %v1231_v46 = vadd.f32 %v1223_v27, %v1203_v20 }
 0x232   : > { %v1219_v28 = vpop.permute.xlu0 %1218  ;;  %v1244_v51 = vpop.permute.xlu1 %1243 }
 0x233   : > { %v1224_v39 = vsel %vm1220_vm5, %v1217_v49, %v1219_v28  ;;  %v1248_v30 = vsel %vm1245_vm8, %v2758_v6, %v1244_v51  ;;  %vm2978_vm5 = vmmov %vm2977_vm4 }
 0x234   : > { %v1232_v52 = vadd.f32 %v1224_v39, %v1204_v41  ;;  %v1255_v42 = vadd.f32 %v1248_v30, %v1231_v46  ;;  %vm2979_vm8 = vmmov %vm2974_vm0 }
 0x236   : > { %v1256_v9 = vadd.f32 %v1244_v51, %v1232_v52  ;;  %v1268_v61 = vpop.permute.xlu0 %1267  ;;  %v1292_v2 = vpop.permute.xlu1 %1291  ;;  %1914 = vmatmul.mubr.msk.bf16.gmra.mrb[36].mxu1 %vm1401_vm11, %v2050_v24 }
 0x237   : > { %v1272_v22 = vsel %vm1269_vm9, %v2777_v15, %v1268_v61  ;;  %1517 = vmatprep.mubr.bf16.mxu1 %v2059_v0  ;;  %v1296_v6 = vsel %vm1293_vm10, %v2764_v43, %v1292_v2  ;;  %vm2980_vm9 = vmmov %vm2974_vm0  ;;  %vm1747_vm10 = vcmask 1043456  }
 0x238   : > { %v1279_v57 = vadd.f32 %v1272_v22, %v1255_v42  ;;  %v1280_v4 = vadd.f32 %v1268_v61, %v1256_v9 }
 0x23a   : > { %v1303_v37 = vadd.f32 %v1296_v6, %v1279_v57  ;;  %v1304_v38 = vadd.f32 %v1292_v2, %v1280_v4  ;;  %v1316_v48 = vpop.permute.xlu0 %1315  ;;  %v1340_v5 = vpop.permute.xlu1 %1339  ;;  %v1738_v57 = vld [vmem:[%s2966_s4] sm:$0xf] }
 0x23b   : > { %v1320_v63 = vsel %vm1317_vm7, %v2790_v16, %v1316_v48  ;;  %v1344_v29 = vsel %vm1341_vm6, %v2785_v19, %v1340_v5  ;;  %vm1608_vm6 = vcmask 850944   ;;  %vm2972_vm7 = vcmask 1031168  }
 0x23c   : > { %v1327_v47 = vadd.f32 %v1320_v63, %v1303_v37  ;;  %v1328_v15 = vadd.f32 %v1316_v48, %v1304_v38  ;;  %vm2975_vm1 = vmmov %vm2972_vm7 }
 0x23d   : > { %vm2976_vm3 = vmmov %vm2975_vm1 }
 0x23e   : > { %v1351_v32 = vadd.f32 %v1344_v29, %v1327_v47  ;;  %v1352_v8 = vadd.f32 %v1340_v5, %v1328_v15 }
 0x240   : > { %v1377_v11 = vmul.f32 %v1366_v10, %v1351_v32  ;;  %v1378_v43 = vmul.f32 %v1370_v62, %v1352_v8 }
 0x242   : > { %v1381_v36 = vpack.c.bf16 %v1377_v11, %v1377_v11  ;;  %v1382_v23 = vpack.c.bf16 %v1378_v43, %v1378_v43 }
 0x244   : > { %1915 = vmatprep.subr.msk.bf16.mxu1 %vm1411_vm2, %v1382_v23  ;;  %v1419_v33 = vsel %vm1411_vm2, %v1381_v36, 0  ;;  %vm1565_vm2 = vcmask 1039360  }
 0x245   : > { %1486 = vmatpush1.bf16.msra.mxu1 %v1419_v33 }
 0x248   : > { %1916 = vmatmul.mubr.msk.bf16.vlgmr.msra.gmra.mrb[40].mxu1 %vm1401_vm11, %v2820_v3 }
 0x249   : > { %1527 = vmatprep.mubr.bf16.mxu1 %v2059_v0 }
 0x24b   : > { %v2921_v4 = vpop.permute.xlu1 %1729 }
 0x250   : > { %1917 = vmatmul.mubr.msk.bf16.gmra.mrb[44].mxu1 %vm1401_vm11, %v2049_v31 }
 0x251   : > { %1537 = vmatprep.mubr.bf16.mxu1 %v2059_v0 }
 0x258   : > { %1918 = vmatmul.mubr.msk.bf16.gmra.mrb[48].mxu1 %vm1401_vm11, %v2050_v24  ;;  %vm1798_vm11 = vcmp.lt.s32.totalorder %v1355_v18, 384 }
 0x2f9   : > { %v2877_v19 = vpop.f32.mrb[28].mxu1 }
 0x2fa   : > { %v1553_v16 = vrot.slane %v2877_v19, 4  ;;  %v2880_v44 = vpop.f32.mrb[29].mxu1 }
 0x2fb   : > { %v1554_v7 = vrot.slane %v2880_v44, 4  ;;  %v1462_v21 = vpop.f32.mrb[30].mxu1 }
 0x2fc   : > { %1557 = vrot.lane.b32.xlu0 %v1553_v16, %s2086_s10  ;;  %v1464_v3 = vpop.f32.mrb[31].mxu1  ;;  %v1596_v26 = vrot.slane %v1462_v21, 4 }
 0x2fd   : > { %1559 = vrot.lane.b32.xlu1 %v1554_v7, %s2086_s10  ;;  %v1597_v25 = vrot.slane %v1464_v3, 4 }
 0x300   : > { %1579 = vrot.lane.b32.xlu0 %v1462_v21, %s2062_s17 }
 0x301   : > { %1581 = vrot.lane.b32.xlu1 %v1464_v3, %s2062_s17  ;;  %v1468_v0 = vpop.f32.mrb[32].mxu1 }
 0x302   : > { %v1470_v34 = vpop.f32.mrb[33].mxu1  ;;  %v1640_v54 = vrot.slane %v1468_v0, 4 }
 0x303   : > { %v1472_v55 = vpop.f32.mrb[34].mxu1  ;;  %v1641_v60 = vrot.slane %v1470_v34, 4 }
 0x304   : > { %1600 = vrot.lane.b32.xlu0 %v1596_v26, %s2087_s11  ;;  %v1474_v13 = vpop.f32.mrb[35].mxu1  ;;  %v1683_v40 = vrot.slane %v1472_v55, 4 }
 0x305   : > { %1602 = vrot.lane.b32.xlu1 %v1597_v25, %s2087_s11  ;;  %v1684_v35 = vrot.slane %v1474_v13, 4 }
 0x308   : > { %1622 = vrot.lane.b32.xlu0 %v1468_v0, %s2088_s12 }
 0x309   : > { %1624 = vrot.lane.b32.xlu1 %v1470_v34, %s2088_s12  ;;  %v1478_v59 = vpop.f32.mrb[36].mxu1 }
 0x30a   : > { %v1480_v56 = vpop.f32.mrb[37].mxu1 }
 0x30b   : > { %v1482_v31 = vpop.f32.mrb[38].mxu1 }
 0x30c   : > { %1644 = vrot.lane.b32.xlu0 %v1640_v54, %s2089_s13  ;;  %v1483_v45 = vpop.f32.mrb[39].mxu1 }
 0x30d   : > { %1646 = vrot.lane.b32.xlu1 %v1641_v60, %s2089_s13 }
 0x310   : > { %1666 = vrot.lane.b32.xlu0 %v1472_v55, %s2067_s24 }
 0x311   : > { %1668 = vrot.lane.b32.xlu1 %v1474_v13, %s2067_s24 }
 0x314   : > { %1689 = vrot.lane.b32.xlu0 %v1684_v35, %s2090_s14 }
 0x315   : > { %1687 = vrot.lane.b32.xlu1 %v1683_v40, %s2090_s14 }
 0x318   : > { %1711 = vrot.lane.b32.xlu0 %v1480_v56, %s2066_s23 }
 0x319   : > { %1709 = vrot.lane.b32.xlu1 %v1478_v59, %s2066_s23 }
 0x31b   : > { %v2899_v50 = vpop.f32.mrb[40].mxu1 }
 0x31c   : > { %v1555_v49 = vrot.slane %v2899_v50, 4  ;;  %v1521_v1 = vpop.f32.mrb[41].mxu1 }
 0x31d   : > { %v1556_v14 = vrot.slane %v1521_v1, 4  ;;  %v1523_v53 = vpop.f32.mrb[42].mxu1 }
 0x31e   : > { %1561 = vrot.lane.b32.xlu0 %v1555_v49, %s2086_s10  ;;  %v1525_v27 = vpop.f32.mrb[43].mxu1  ;;  %v1598_v41 = vrot.slane %v1523_v53, 4 }
 0x31f   : > { %1563 = vrot.lane.b32.xlu1 %v1556_v14, %s2086_s10  ;;  %v1599_v51 = vrot.slane %v1525_v27, 4 }
 0x322   : > { %1583 = vrot.lane.b32.xlu0 %v1523_v53, %s2062_s17 }
 0x323   : > { %1585 = vrot.lane.b32.xlu1 %v1525_v27, %s2062_s17  ;;  %v1529_v20 = vpop.f32.mrb[44].mxu1 }
 0x324   : > { %v1531_v28 = vpop.f32.mrb[45].mxu1  ;;  %v1642_v46 = vrot.slane %v1529_v20, 4 }
 0x325   : > { %v1533_v24 = vpop.f32.mrb[46].mxu1  ;;  %v1643_v42 = vrot.slane %v1531_v28, 4 }
 0x326   : > { %1604 = vrot.lane.b32.xlu0 %v1598_v41, %s2087_s11  ;;  %v1535_v39 = vpop.f32.mrb[47].mxu1  ;;  %v1685_v2 = vrot.slane %v1533_v24, 4 }
 0x327   : > { %1606 = vrot.lane.b32.xlu1 %v1599_v51, %s2087_s11  ;;  %v1686_v22 = vrot.slane %v1535_v39, 4 }
 0x32a   : > { %1626 = vrot.lane.b32.xlu0 %v1529_v20, %s2088_s12 }
 0x32b   : > { %1628 = vrot.lane.b32.xlu1 %v1531_v28, %s2088_s12  ;;  %v1539_v30 = vpop.f32.mrb[48].mxu1 }
 0x32c   : > { %v1541_v52 = vpop.f32.mrb[49].mxu1 }
 0x32d   : > { %v1543_v9 = vpop.f32.mrb[50].mxu1 }
 0x32e   : > { %1648 = vrot.lane.b32.xlu0 %v1642_v46, %s2089_s13  ;;  %v1544_v61 = vpop.f32.mrb[51].mxu1 }
 0x32f   : > { %1650 = vrot.lane.b32.xlu1 %v1643_v42, %s2089_s13 }
 0x332   : > { %1670 = vrot.lane.b32.xlu0 %v1533_v24, %s2067_s24 }
 0x333   : > { %1691 = vrot.lane.b32.xlu1 %v1685_v2, %s2090_s14 }
 0x336   : > { %1672 = vrot.lane.b32.xlu0 %v1535_v39, %s2067_s24 }
 0x337   : > { %1713 = vrot.lane.b32.xlu1 %v1539_v30, %s2066_s23 }
 0x33a   : > { %1693 = vrot.lane.b32.xlu0 %v1686_v22, %s2090_s14 }
 0x33b   : > { %1715 = vrot.lane.b32.xlu1 %v1541_v52, %s2066_s23  ;;  %s1969_s23 = smul.u32 3, %s2982_s22 }
 0x33d   : > { %s249_s18 = scalar_lea.vmem %s2968_s6, %s1969_s23 }
 0x33e   : > { %1741 = vperm.xlu0 %2012, %v1738_v57  }
 0x36e   : > { %v1558_v58 = vpop.permute.xlu0 %1557 }
 0x36f   : > { %v1560_v12 = vpop.permute.xlu1 %1559 }
 0x370   : > { %v1566_v47 = vsel %vm1565_vm2, %v1558_v58, %v1560_v12 }
 0x371   : > { %v1572_v62 = vadd.f32 %v1566_v47, %v2877_v19 }
 0x372   : > { %v1580_v6 = vpop.permute.xlu0 %1579 }
 0x373   : > { %v1582_v37 = vpop.permute.xlu1 %1581 }
 0x374   : > { %v1587_v15 = vsel %vm2972_vm7, %v1580_v6, %v1582_v37 }
 0x375   : > { %v1593_v8 = vadd.f32 %v1587_v15, %v1572_v62 }
 0x376   : > { %v1601_v38 = vpop.permute.xlu0 %1600 }
 0x377   : > { %v1603_v48 = vpop.permute.xlu1 %1602 }
 0x378   : > { %v1609_v32 = vsel %vm1608_vm6, %v1601_v38, %v1603_v48 }
 0x379   : > { %v1615_v36 = vadd.f32 %v1609_v32, %v1593_v8 }
 0x37a   : > { %v1623_v5 = vpop.permute.xlu0 %1622 }
 0x37b   : > { %v1625_v63 = vpop.permute.xlu1 %1624 }
 0x37c   : > { %v1631_v11 = vsel %vm1630_vm12, %v1623_v5, %v1625_v63 }
 0x37d   : > { %v1637_v16 = vadd.f32 %v1631_v11, %v1615_v36 }
 0x37e   : > { %v1645_v10 = vpop.permute.xlu0 %1644 }
 0x37f   : > { %v1647_v29 = vpop.permute.xlu1 %1646 }
 0x380   : > { %v1653_v33 = vsel %vm1652_vm13, %v1645_v10, %v1647_v29 }
 0x381   : > { %v1659_v3 = vadd.f32 %v1653_v33, %v1637_v16 }
 0x382   : > { %v1667_v43 = vpop.permute.xlu0 %1666 }
 0x383   : > { %v1669_v23 = vpop.permute.xlu1 %1668 }
 0x384   : > { %v1674_v7 = vsel %vm2973_vm15, %v1667_v43, %v1669_v23 }
 0x385   : > { %v1680_v26 = vadd.f32 %v1674_v7, %v1659_v3 }
 0x386   : > { %v1690_v21 = vpop.permute.xlu0 %1689 }
 0x387   : > { %v1688_v19 = vpop.permute.xlu1 %1687 }
 0x388   : > { %v1696_v0 = vsel %vm1695_vm14, %v1688_v19, %v1690_v21 }
 0x389   : > { %v1702_v25 = vadd.f32 %v1696_v0, %v1680_v26 }
 0x38a   : > { %v1712_v34 = vpop.permute.xlu0 %1711 }
 0x38b   : > { %v1710_v55 = vpop.permute.xlu1 %1709 }
 0x38c   : > { %v1717_v13 = vsel %vm2974_vm0, %v1710_v55, %v1712_v34 }
 0x38d   : > { %v1723_v54 = vadd.f32 %v1717_v13, %v1702_v25 }
 0x38f   : > { %v1732_v60 = vadd.f32 %v2921_v4, %v1723_v54 }
 0x390   : > { %v1562_v59 = vpop.permute.xlu0 %1561 }
 0x391   : > { %v1564_v56 = vpop.permute.xlu1 %1563  ;;  %v1567_v40 = vsel %vm1565_vm2, %v1560_v12, %v1562_v59 }
 0x392   : > { %v1573_v14 = vadd.f32 %v1567_v40, %v2880_v44  ;;  %v1568_v28 = vsel %vm1565_vm2, %v1562_v59, %v1564_v56 }
 0x393   : > { %v1574_v42 = vadd.f32 %v1568_v28, %v2899_v50 }
 0x394   : > { %v1584_v31 = vpop.permute.xlu0 %1583 }
 0x395   : > { %v1586_v45 = vpop.permute.xlu1 %1585  ;;  %v1588_v1 = vsel %vm2975_vm1, %v1582_v37, %v1584_v31 }
 0x396   : > { %v1594_v41 = vadd.f32 %v1588_v1, %v1573_v14  ;;  %v1589_v30 = vsel %vm2976_vm3, %v1584_v31, %v1586_v45  ;;  %v2091_v45 = vmov 1966171168  }
 0x397   : > { %v1595_v61 = vadd.f32 %v1589_v30, %v1574_v42 }
 0x398   : > { %v1605_v35 = vpop.permute.xlu0 %1604 }
 0x399   : > { %v1607_v49 = vpop.permute.xlu1 %1606  ;;  %v1610_v27 = vsel %vm1608_vm6, %v1603_v48, %v1605_v35 }
 0x39a   : > { %v1616_v24 = vadd.f32 %v1610_v27, %v1594_v41  ;;  %v1611_v44 = vsel %vm1608_vm6, %v1605_v35, %v1607_v49  ;;  %v1774_v35 = vunpack.c.l.s4 %v2091_v45 }
 0x39b   : > { %v1617_v6 = vadd.f32 %v1611_v44, %v1595_v61 }
 0x39c   : > { %v1627_v53 = vpop.permute.xlu0 %1626 }
 0x39d   : > { %v1629_v20 = vpop.permute.xlu1 %1628  ;;  %v1632_v51 = vsel %vm1630_vm12, %v1625_v63, %v1627_v53 }
 0x39e   : > { %v1638_v9 = vadd.f32 %v1632_v51, %v1616_v24  ;;  %v1633_v57 = vsel %vm1630_vm12, %v1627_v53, %v1629_v20  ;;  %v1775_v53 = vunpack.c.0.s8 %v1774_v35 }
 0x39f   : > { %v1639_v5 = vadd.f32 %v1633_v57, %v1617_v6 }
 0x3a0   : > { %v1649_v39 = vpop.permute.xlu0 %1648 }
 0x3a1   : > { %v1654_v46 = vsel %vm1652_vm13, %v1647_v29, %v1649_v39  ;;  %v1651_v52 = vpop.permute.xlu1 %1650 }
 0x3a2   : > { %v1660_v2 = vadd.f32 %v1654_v46, %v1638_v9  ;;  %v1655_v48 = vsel %vm1652_vm13, %v1649_v39, %v1651_v52  ;;  %v1778_v39 = vsub.s32 %v1775_v53, %v2788_v17 }
 0x3a3   : > { %v1661_v10 = vadd.f32 %v1655_v48, %v1639_v5 }
 0x3a4   : > { %v1671_v22 = vpop.permute.xlu0 %1670 }
 0x3a5   : > { %v1675_v58 = vsel %vm2977_vm4, %v1669_v23, %v1671_v22  ;;  %v1692_v12 = vpop.permute.xlu1 %1691 }
 0x3a6   : > { %v1681_v37 = vadd.f32 %v1675_v58, %v1660_v2  ;;  %v1697_v38 = vsel %vm1695_vm14, %v1690_v21, %v1692_v12  ;;  %v1735_v21 = vmax.f32 %v1732_v60, 0.0 }
 0x3a8   : > { %v1703_v63 = vadd.f32 %v1697_v38, %v1681_v37  ;;  %v1673_v50 = vpop.permute.xlu0 %1672 }
 0x3a9   : > { %v1676_v47 = vsel %vm2978_vm5, %v1671_v22, %v1673_v50  ;;  %v1714_v15 = vpop.permute.xlu1 %1713 }
 0x3aa   : > { %v1718_v62 = vsel %vm2979_vm8, %v1712_v34, %v1714_v15  ;;  %v1682_v32 = vadd.f32 %v1676_v47, %v1661_v10 }
 0x3ab   : > { %v1724_v29 = vadd.f32 %v1718_v62, %v1703_v63 }
 0x3ac   : > { %v1694_v8 = vpop.permute.xlu0 %1693 }
 0x3ad   : > { %v1698_v11 = vsel %vm1695_vm14, %v1692_v12, %v1694_v8  ;;  %v1716_v43 = vpop.permute.xlu1 %1715  ;;  %v1733_v36 = vadd.f32 %v2921_v4, %v1724_v29 }
 0x3ae   : > { %v1704_v23 = vadd.f32 %v1698_v11, %v1682_v32  ;;  %v1719_v33 = vsel %vm2980_vm9, %v1714_v15, %v1716_v43 }
 0x3af   : > { %v1736_v3 = vmax.f32 %v1733_v36, 0.0 }
 0x3b0   : > { %v1725_v16 = vadd.f32 %v1719_v33, %v1704_v23 }
 0x3b2   : > { %v1734_v7 = vadd.f32 %v2921_v4, %v1725_v16 }
 0x3b4   : > { %v1737_v19 = vmax.f32 %v1734_v7, 0.0 }
 0x3bd   : > { %v1742_v0 = vpop.permute.xlu0 %1741 }
 0x3be   : > { %v1744_v26 = vmul.f32 %v1742_v0, %v1735_v21  ;;  %v1745_v34 = vmul.f32 %v1742_v0, %v1736_v3  ;;  %v1746_v25 = vmul.f32 %v1742_v0, %v1737_v19 }
 0x3c0   : > { %v1748_v55 = vsel %vm1747_vm10, %v1744_v26, 0.0  ;;  %v1755_v13 = vsel %vm1747_vm10, %v1745_v34, 0.0  ;;  %v1762_v54 = vsel %vm1747_vm10, %v1746_v25, 0.0 }
 0x3c1   : > { %v1749_v59 = vrot.slane %v1748_v55, 4  ;;  %v1756_v56 = vrot.slane %v1755_v13, 4  ;;  %v1763_v31 = vrot.slane %v1762_v54, 4 }
 0x3c3   : > { %v1750_v40 = vadd.f32 %v1749_v59, %v1748_v55  ;;  %v1757_v49 = vadd.f32 %v1756_v56, %v1755_v13  ;;  %v1764_v1 = vadd.f32 %v1763_v31, %v1762_v54 }
 0x3c5   : > { %v1751_v4 = vrot.slane %v1750_v40, 2  ;;  %v1758_v60 = vrot.slane %v1757_v49, 2  ;;  %v1765_v14 = vrot.slane %v1764_v1, 2 }
 0x3c7   : > { %v1752_v27 = vadd.f32 %v1751_v4, %v1750_v40  ;;  %v1759_v20 = vadd.f32 %v1758_v60, %v1757_v49  ;;  %v1766_v41 = vadd.f32 %v1765_v14, %v1764_v1 }
 0x3c9   : > { %v1753_v28 = vrot.slane %v1752_v27, 1  ;;  %v1760_v51 = vrot.slane %v1759_v20, 1  ;;  %v1767_v24 = vrot.slane %v1766_v41, 1 }
 0x3cb   : > { %v1754_v30 = vadd.f32 %v1753_v28, %v1752_v27  ;;  %v1761_v46 = vadd.f32 %v1760_v51, %v1759_v20  ;;  %v1768_v52 = vadd.f32 %v1767_v24, %v1766_v41 }
 0x3cd   : > { %v1772_v42 = vcombine.low %v1754_v30, %v1761_v46  ;;  %v1786_v44 = vrot.slane %v1768_v52, %v1778_v39 }
 0x3cf   : > { %v1779_v9 = vrot.slane %v1772_v42, %v1778_v39 }
 0x3d1   : > { %v1787_v61 = vcombine.low %v1779_v9, %v1786_v44 }
 0x3d3   : > { %v1794_v2 = vrot.slane %v1787_v61, %v1778_v39 }
 0x3d5   : > { %1800 = vst.msk [vmem:[%s249_s18] sm:$0x7] %vm1798_vm11, %v1794_v2 }
 0x3d6 PF: > { %s16_s21 = sadd.s32 1, %s2057_s21  }
 0x3d7   : > { %p13_p4 = scmp.ge.s32.totalorder %s16_s21, 4  }
 0x3d9   :  { %15 = sbr.rel (!%p13_p4) target bundleno = 1 (0x1), region = 74 }

</bundles_post_ra>
